<compile_context>
chip_gen: v6e
topology: v6e:2x2x1
jax: 0.10.0
libtpu: 0.0.40
codegen_flags: <defaults>
</compile_context>

<pallas_src>
import functools

import numpy as np
import jax
import jax.numpy as jnp
from jax.experimental import pallas as pl
from jax.experimental.pallas import tpu as pltpu

OUT_H, OUT_W = 480, 640   # cv.resize(rotated_img, (640, 480)) -> 480 rows x 640 cols
C_PAD = 8                 # channels padded to one f32 sublane group
TILE_OH = 8               # rotated-output rows per warp n-tile
TILE_K_MAX = 1024         # source-pixel (K) tile upper bound


def _round_up(x, m):
    return ((x + m - 1) // m) * m


def _vmem_limit_bytes():
    """~75% of physical per-core VMEM (v5e/v6e: 128 MiB, v7x: 64 MiB) with headroom."""
    try:
        cap = int(pltpu.get_tpu_info().vmem_capacity_bytes)
    except Exception:
        cap = 64 * 1024 * 1024          # conservative fallback (v7x-sized)
    return (cap * 3) // 4


# --------------------------------------------------------------------------
# Host-side glue: rotation matrix + sampling-operator construction (mirrors
# cv.getRotationMatrix2D / cv.warpAffine / cv.resize indexing).
# --------------------------------------------------------------------------
def get_rotation_matrix_2d(center, angle_deg, scale=1.0):
    """Replicates cv.getRotationMatrix2D."""
    a = np.deg2rad(angle_deg)
    alpha = scale * np.cos(a)
    beta = scale * np.sin(a)
    cx, cy = center
    return np.array(
        [[alpha, beta, (1.0 - alpha) * cx - beta * cy],
         [-beta, alpha, beta * cx + (1.0 - alpha) * cy]], dtype=np.float64)


def build_affine(angle, in_h, in_w):
    """cv.getRotationMatrix2D + canvas expansion, exactly as the PyTorch module."""
    M = get_rotation_matrix_2d((in_w / 2.0, in_h / 2.0), angle, 1.0)
    cos_, sin_ = abs(M[0, 0]), abs(M[0, 1])
    new_w = int(cos_ * in_w + sin_ * in_h)
    new_h = int(sin_ * in_w + cos_ * in_h)
    M[0, 2] += new_w / 2.0 - in_w / 2.0
    M[1, 2] += new_h / 2.0 - in_h / 2.0
    return M, new_h, new_w


def _bilinear_taps(M, in_h, in_w, new_h, new_w):
    """Destination->source 4-tap bilinear sampling of
    cv.warpAffine(img, M, (new_w, new_h), INTER_LINEAR, borderValue=0)."""
    A = M[:, :2]
    t = M[:, 2]
    Ainv = np.linalg.inv(A)
    tinv = -Ainv @ t
    ys, xs = np.meshgrid(np.arange(new_h), np.arange(new_w), indexing="ij")
    sx = Ainv[0, 0] * xs + Ainv[0, 1] * ys + tinv[0]
    sy = Ainv[1, 0] * xs + Ainv[1, 1] * ys + tinv[1]
    x0 = np.floor(sx).astype(np.int64)
    y0 = np.floor(sy).astype(np.int64)
    fx = sx - x0
    fy = sy - y0
    taps = []
    for dy, dx, w in ((0, 0, (1 - fy) * (1 - fx)), (0, 1, (1 - fy) * fx),
                      (1, 0, fy * (1 - fx)), (1, 1, fy * fx)):
        yy = y0 + dy
        xx = x0 + dx
        ok = (yy >= 0) & (yy < in_h) & (xx >= 0) & (xx < in_w) & (w > 0)
        taps.append((yy, xx, w.astype(np.float32), ok))
    return ys, xs, taps


def build_banded_warp(M, in_h, in_w, hw_pad, new_h, new_w, nh_pad, nw_pad, tile_k):
    """Band-compacted, transposed bilinear-sampling operator:

        rot_flat[c, oy*nw_pad + ox] =
            sum_j img_flat[c, band_start[oy//TILE_OH]*tile_k + j] * wt_band[j, oy*nw_pad + ox]

    Only the source-pixel band a row-tile actually touches is stored/streamed
    (the k grid walks the band, not all of hw_pad).  Output columns live on the
    zero-padded (nh_pad, nw_pad) grid so the flat result reshapes for free into
    an (8,128)-aligned CHW slab feeding the resize."""
    ys, xs, taps = _bilinear_taps(M, in_h, in_w, new_h, new_w)
    num_k_tiles = hw_pad // tile_k
    n_row_tiles = nh_pad // TILE_OH

    band_start = np.zeros(n_row_tiles, np.int64)
    band_len = np.ones(n_row_tiles, np.int64)
    for t in range(n_row_tiles):
        r0, r1 = t * TILE_OH, min((t + 1) * TILE_OH, new_h)
        kmin, kmax = None, None
        if r0 < r1:
            for yy, xx, w, ok in taps:
                m = ok[r0:r1]
                if m.any():
                    kk = (yy[r0:r1] * in_w + xx[r0:r1])[m]
                    lo, hi = int(kk.min()), int(kk.max())
                    kmin = lo if kmin is None else min(kmin, lo)
                    kmax = hi if kmax is None else max(kmax, hi)
        if kmin is not None:
            band_start[t] = kmin // tile_k
            band_len[t] = kmax // tile_k + 1 - band_start[t]
    max_band = int(band_len.max())
    # clamp so band_start[t] + max_band always stays within hw_pad // tile_k
    band_start = np.maximum(np.minimum(band_start, num_k_tiles - max_band), 0)

    wt_band = np.zeros((max_band * tile_k, nh_pad * nw_pad), dtype=np.float32)
    out_cols = ys * nw_pad + xs
    k_base = band_start[ys // TILE_OH] * tile_k
    for yy, xx, w, ok in taps:
        klocal = yy * in_w + xx - k_base
        np.add.at(wt_band, (klocal[ok], out_cols[ok]), w[ok])
    return wt_band, band_start.astype(np.int32), max_band


def build_area_resize_matrix(in_n, out_n, in_n_pad):
    """Separable pixel-area resampling matrix (spirit of cv.INTER_AREA),
    columns zero-padded to the aligned input extent."""
    # TODO(synk): OpenCV's INTER_AREA upscale path uses a bilinear-like fixed
    # point scheme; this continuous area-overlap operator is close, not bit-exact.
    scale = in_n / out_n
    R = np.zeros((out_n, in_n_pad), dtype=np.float32)
    for i in range(out_n):
        a, b = i * scale, (i + 1) * scale
        r0 = int(np.floor(a))
        r1 = min(int(np.ceil(b)), in_n)
        for r in range(r0, r1):
            ov = min(b, r + 1) - max(a, r)
            if ov > 0:
                R[i, r] = ov / scale
    return R


def reference_rotate_resize(img, M, new_h, new_w):
    """Pure-numpy f64 reference: bilinear warpAffine (borderValue=0) + area resize."""
    in_h, in_w, c = img.shape
    _, _, taps = _bilinear_taps(M, in_h, in_w, new_h, new_w)
    rot = np.zeros((new_h, new_w, c), np.float64)
    for yy, xx, w, ok in taps:
        vals = img[np.clip(yy, 0, in_h - 1), np.clip(xx, 0, in_w - 1)].astype(np.float64)
        rot += np.where(ok[..., None], w[..., None] * vals, 0.0)
    ry = build_area_resize_matrix(new_h, OUT_H, new_h).astype(np.float64)
    rx = build_area_resize_matrix(new_w, OUT_W, new_w).astype(np.float64)
    return np.einsum("ij,jkc,lk->ilc", ry, rot, rx)


# --------------------------------------------------------------------------
# Pallas kernels
# --------------------------------------------------------------------------
def _warp_kernel(band_ref, img_ref, wt_ref, out_ref, acc_ref):
    # out[C_PAD, tile_n] = sum_k img[C_PAD, tile_k] @ wt_band[tile_k, tile_n]
    # The k axis walks only this row-tile's source band: the scalar-prefetched
    # band offsets drive both the img and wt index_maps.  The out block index
    # is constant across k -> accumulator pattern.  Output is stored bf16, so
    # the f32 accumulation lives in a small VMEM scratch (cast in final store).
    del band_ref                     # consumed by the index_maps only
    k = pl.program_id(1)

    @pl.when(k == 0)
    def _():
        acc_ref[...] = jnp.zeros_like(acc_ref)

    acc_ref[...] += jnp.dot(img_ref[...], wt_ref[...],
                            preferred_element_type=jnp.float32)

    @pl.when(k == pl.num_programs(1) - 1)
    def _():
        out_ref[...] = acc_ref[...].astype(out_ref.dtype)


def _resize_kernel(rot_ref, ry_ref, rxt_ref, out_ref, *, width_first):
    # One rotated channel per grid step: out = Ry @ rot @ RxT, contraction order
    # picked on the host for the cheaper FLOP count (review item 10).
    if width_first:
        t = jnp.dot(rot_ref[...], rxt_ref[...], preferred_element_type=jnp.float32)
        out_ref[...] = jnp.dot(ry_ref[...], t, preferred_element_type=jnp.float32)
    else:
        t = jnp.dot(ry_ref[...], rot_ref[...], preferred_element_type=jnp.float32)
        out_ref[...] = jnp.dot(t, rxt_ref[...], preferred_element_type=jnp.float32)


# --------------------------------------------------------------------------
# Module wrapper
# --------------------------------------------------------------------------
class AffineTransform:
    """JAX/Pallas port of the PyTorch AffineTransform data-aug module
    (GAUSS random mode, p=(0, 0.3), angle=(-40, 40))."""

    def __init__(self, angle=(-40, 40), p=(0, 0.3), seed=0):
        self.avg_angle = sum(angle) / len(angle)
        self.r_angle = angle[-1] - self.avg_angle
        self._p = p
        self._rng = np.random.default_rng(seed)     # deterministic, host-side

    def _random(self):
        return float(self._rng.normal(self._p[0], self._p[1]))

    def __call__(self, x, label, nlabel):
        angle = round(self._random() * self.r_angle + self.avg_angle)
        pts = label[:nlabel, 1:].reshape(-1, 4, 2).astype(jnp.float32)
        new_img, new_pts = self.rotate_img(x, pts, angle)
        label = label.at[:nlabel, 1:].set(new_pts.reshape(-1, 8))
        return new_img, label, nlabel

    @staticmethod
    def rotate_img(img, points, angle):
        in_h, in_w, c = img.shape
        assert c <= C_PAD, "channel count must fit the padded sublane group"
        M, new_h, new_w = build_affine(angle, in_h, in_w)

        # ---- static tiling / padding (host) ----
        nh_pad = _round_up(new_h, TILE_OH)      # sublane-aligned rotated height
        nw_pad = _round_up(new_w, 128)          # lane-aligned rotated width
        nhw_pad = nh_pad * nw_pad
        tile_n = TILE_OH * nw_pad               # one warp n-tile = TILE_OH output rows
        # keep the double-buffered WT tile within ~16 MiB (v7x VMEM headroom)
        tile_k = TILE_K_MAX if tile_n * TILE_K_MAX * 2 * 2 <= 16 * 1024 * 1024 else 512
        hw = in_h * in_w
        hw_pad = _round_up(hw, tile_k)
        n_row_tiles = nh_pad // TILE_OH
        vmem_limit = _vmem_limit_bytes()

        # ---- host-built sampling operators (banded warp + area resize), bf16 ----
        wt_band_np, band_start_np, max_band = build_banded_warp(
            M, in_h, in_w, hw_pad, new_h, new_w, nh_pad, nw_pad, tile_k)
        wt_band = jnp.asarray(wt_band_np, jnp.bfloat16)      # (max_band*tile_k, nhw_pad)
        band_start = jnp.asarray(band_start_np, jnp.int32)   # (n_row_tiles,)
        ry = jnp.asarray(build_area_resize_matrix(new_h, OUT_H, nh_pad), jnp.bfloat16)
        rxt = jnp.asarray(build_area_resize_matrix(new_w, OUT_W, nw_pad).T, jnp.bfloat16)

        # image -> lane-dense (C_PAD, hw_pad) bf16 slab (zero-padded rows/cols)
        img_slab = jnp.zeros((C_PAD, hw_pad), jnp.bfloat16)
        img_slab = img_slab.at[:c, :hw].set(img.reshape(hw, c).T.astype(jnp.bfloat16))

        # ---- Pallas kernel 1: banded bilinear-warp matmul, CHW-flat bf16 out ----
        rot_flat = pl.pallas_call(
            _warp_kernel,
            out_shape=jax.ShapeDtypeStruct((C_PAD, nhw_pad), jnp.bfloat16),
            grid_spec=pltpu.PrefetchScalarGridSpec(
                num_scalar_prefetch=1,
                grid=(n_row_tiles, max_band),
                in_specs=[
                    # image band window: tiny (C_PAD, tile_k) block per step
                    # (<1% of the WT stream), addressed by the same
                    # scalar-prefetched band offsets as the WT tiles.
                    pl.BlockSpec((C_PAD, tile_k), lambda n, k, band: (0, band[n] + k)),
                    # banded warp operator: k walks only this row-tile's band
                    pl.BlockSpec((tile_k, tile_n), lambda n, k, band: (k, n)),
                ],
                out_specs=pl.BlockSpec((C_PAD, tile_n), lambda n, k, band: (0, n)),
                scratch_shapes=[pltpu.VMEM((C_PAD, tile_n), jnp.float32)]),
            compiler_params=pltpu.CompilerParams(
                dimension_semantics=("parallel", "arbitrary"),
                vmem_limit_bytes=vmem_limit),
        )(band_start, img_slab, wt_band)

        # free row-major reshape; NO [:c] slice copy -- the resize grid reads
        # only the first c channels of the padded slab via its index_map.
        rot = rot_flat.reshape(C_PAD, nh_pad, nw_pad)

        # ---- Pallas kernel 2: separable area resize, one channel per grid step ----
        width_first = (nh_pad * OUT_W * (nw_pad + OUT_H)
                       <= nw_pad * OUT_H * (nh_pad + OUT_W))
        resized = pl.pallas_call(
            functools.partial(_resize_kernel, width_first=width_first),
            out_shape=jax.ShapeDtypeStruct((c, OUT_H, OUT_W), jnp.float32),
            grid_spec=pltpu.PrefetchScalarGridSpec(
                num_scalar_prefetch=0,
                grid=(c,),
                in_specs=[
                    pl.BlockSpec((None, nh_pad, nw_pad), lambda i: (i, 0, 0)),
                    pl.BlockSpec((OUT_H, nh_pad), lambda i: (0, 0)),
                    pl.BlockSpec((nw_pad, OUT_W), lambda i: (0, 0)),
                ],
                out_specs=pl.BlockSpec((None, OUT_H, OUT_W), lambda i: (i, 0, 0))),
            compiler_params=pltpu.CompilerParams(
                dimension_semantics=("parallel",),
                vmem_limit_bytes=vmem_limit),
        )(rot, ry, rxt)
        resized = resized.transpose(1, 2, 0)        # (480, 640, C) HWC like cv

        # ---- label-point affine transform + rescale (plain jnp; ~8 points) ----
        # TODO(synk): original casts points to float64; TPU path uses f32.
        # NOTE: the (in_w/new_w, in_h/new_h) rescale mirrors the PyTorch module
        # verbatim (it rescales to the *input* size even though the image is
        # resized to 640x480).
        Mj = jnp.asarray(M, dtype=jnp.float32)                      # (2, 3)
        new_pts = points @ Mj[:, :2].T + Mj[:, 2]                   # (N, 4, 2)
        new_pts = new_pts * jnp.asarray([in_w / new_w, in_h / new_h], jnp.float32)
        return resized, new_pts


if __name__ == "__main__":
    key = jax.random.PRNGKey(0)
    kx, kl = jax.random.split(key)
    H, W, C = 16, 16, 3
    # image in [0, 255] float32 (stand-in for the uint8 cv image)
    x = jax.random.uniform(kx, (H, W, C), jnp.float32, 0.0, 255.0)
    n_max, nlabel = 8, 2
    # label: col 0 = class id, cols 1..8 = 4 (x, y) corner points
    label = jax.random.uniform(kl, (n_max, 9), jnp.float32, 0.0, float(W))

    aug = AffineTransform(angle=(-40, 40), p=(0, 0.3), seed=0)
    img_out, label_out, n_out = aug(x, label, nlabel)
    jax.block_until_ready((img_out, label_out))

    assert img_out.shape == (OUT_H, OUT_W, C) and img_out.dtype == jnp.float32
    assert bool(jnp.all(jnp.isfinite(img_out)))
    assert label_out.shape == (n_max, 9)
    assert n_out == nlabel

    # numerical check of the Pallas path against a pure-numpy reference
    angle = 17
    M, new_h, new_w = build_affine(angle, H, W)
    ref = reference_rotate_resize(np.asarray(x, np.float64), M, new_h, new_w)
    got, _ = AffineTransform.rotate_img(x, jnp.zeros((1, 4, 2), jnp.float32), angle)
    jax.block_until_ready(got)
    err = float(jnp.max(jnp.abs(got - jnp.asarray(ref, jnp.float32))))
    assert err < 8.0, f"max abs error vs reference: {err}"   # bf16 operands, 0..255 data
    print("KERNEL_OK")
</pallas_src>

<mosaic_0001>
module attributes {stable_mosaic.version = 11 : i64} {
  func.func @_warp_kernel(%arg0: i32, %arg1: i32, %arg2: memref<2xi32, #tpu.memory_space<smem>>, %arg3: memref<8x1024xbf16, #tpu.memory_space<vmem>>, %arg4: memref<1024x1024xbf16, #tpu.memory_space<vmem>>, %arg5: memref<8x1024xbf16, #tpu.memory_space<vmem>>, %arg6: memref<8x1024xf32, #tpu.memory_space<vmem>>) attributes {dimension_semantics = [#tpu.dimension_semantics<parallel>, #tpu.dimension_semantics<arbitrary>], iteration_bounds = array<i64: 2, 1>, scalar_prefetch = 1 : i64, scratch_operands = 1 : i64, tpu.core_type = #tpu.core_type<tc>, window_params = [{transform_indices = @transform_0, window_bounds = array<i64: 8, 1024>}, {transform_indices = @transform_1, window_bounds = array<i64: 1024, 1024>}, {transform_indices = @transform_2, window_bounds = array<i64: 8, 1024>}]} {
    %c0_i32 = arith.constant 0 : i32
    %0 = arith.cmpi eq, %arg1, %c0_i32 : i32
    %1 = arith.extui %0 : i1 to i32
    %c0_i32_0 = arith.constant 0 : i32
    %2 = arith.cmpi ne, %1, %c0_i32_0 : i32
    scf.if %2 {
      %cst_10 = arith.constant 0.000000e+00 : f32
      %12 = vector.broadcast %cst_10 : f32 to vector<8x1024xf32>
      %c0_11 = arith.constant 0 : index
      %c0_12 = arith.constant 0 : index
      %13 = vector.load %arg6[%c0_11, %c0_12] : memref<8x1024xf32, #tpu.memory_space<vmem>>, vector<8x1024xf32>
      tpu.vector_store %arg6[%c0_11, %c0_12], %12 {strides = array<i32>} : memref<8x1024xf32, #tpu.memory_space<vmem>>, vector<8x1024xf32>,
    } else {
    }
    %c0 = arith.constant 0 : index
    %c0_1 = arith.constant 0 : index
    %3 = vector.load %arg6[%c0, %c0_1] : memref<8x1024xf32, #tpu.memory_space<vmem>>, vector<8x1024xf32>
    %c0_2 = arith.constant 0 : index
    %c0_3 = arith.constant 0 : index
    %4 = vector.load %arg3[%c0_2, %c0_3] : memref<8x1024xbf16, #tpu.memory_space<vmem>>, vector<8x1024xbf16>
    %c0_4 = arith.constant 0 : index
    %c0_5 = arith.constant 0 : index
    %5 = vector.load %arg4[%c0_4, %c0_5] : memref<1024x1024xbf16, #tpu.memory_space<vmem>>, vector<1024x1024xbf16>
    %cst = arith.constant dense<0.000000e+00> : vector<8x1024xf32>
    %6 = tpu.matmul %4, %5, %cst {dimension_numbers = #tpu.dot_dimension_numbers<[1], [0], [0], [1], [0, 0, 1, 1], [], []>} : vector<8x1024xbf16>, vector<1024x1024xbf16>, vector<8x1024xf32> -> vector<8x1024xf32>
    %7 = arith.addf %3, %6 : vector<8x1024xf32>
    %c0_6 = arith.constant 0 : index
    %c0_7 = arith.constant 0 : index
    %8 = vector.load %arg6[%c0_6, %c0_7] : memref<8x1024xf32, #tpu.memory_space<vmem>>, vector<8x1024xf32>
    tpu.vector_store %arg6[%c0_6, %c0_7], %7 {strides = array<i32>} : memref<8x1024xf32, #tpu.memory_space<vmem>>, vector<8x1024xf32>,
    %c0_i32_8 = arith.constant 0 : i32
    %9 = arith.cmpi eq, %arg1, %c0_i32_8 : i32
    %10 = arith.extui %9 : i1 to i32
    %c0_i32_9 = arith.constant 0 : i32
    %11 = arith.cmpi ne, %10, %c0_i32_9 : i32
    scf.if %11 {
      %c0_10 = arith.constant 0 : index
      %c0_11 = arith.constant 0 : index
      %12 = vector.load %arg6[%c0_10, %c0_11] : memref<8x1024xf32, #tpu.memory_space<vmem>>, vector<8x1024xf32>
      %13 = arith.truncf %12 : vector<8x1024xf32> to vector<8x1024xbf16>
      %c0_12 = arith.constant 0 : index
      %c0_13 = arith.constant 0 : index
      %14 = vector.load %arg5[%c0_12, %c0_13] : memref<8x1024xbf16, #tpu.memory_space<vmem>>, vector<8x1024xbf16>
      tpu.vector_store %arg5[%c0_12, %c0_13], %13 {strides = array<i32>} : memref<8x1024xbf16, #tpu.memory_space<vmem>>, vector<8x1024xbf16>,
    } else {
    }
    return
  }
  func.func @transform_0(%arg0: i32, %arg1: i32, %arg2: memref<2xi32, #tpu.memory_space<smem>>) -> (i32, i32) {
    %0 = arith.index_cast %arg0 : i32 to index
    %1 = memref.load %arg2[%0] : memref<2xi32, #tpu.memory_space<smem>>
    %2 = arith.addi %1, %arg1 : i32
    %c0_i32 = arith.constant 0 : i32
    %c0_i32_0 = arith.constant 0 : i32
    return %c0_i32, %2 : i32, i32
  }
  func.func @transform_1(%arg0: i32, %arg1: i32, %arg2: memref<2xi32, #tpu.memory_space<smem>>) -> (i32, i32) {
    %c0_i32 = arith.constant 0 : i32
    return %arg1, %arg0 : i32, i32
  }
  func.func @transform_2(%arg0: i32, %arg1: i32, %arg2: memref<2xi32, #tpu.memory_space<smem>>) -> (i32, i32) {
    %c0_i32 = arith.constant 0 : i32
    %c0_i32_0 = arith.constant 0 : i32
    return %c0_i32, %arg0 : i32, i32
  }
}

</mosaic_0001>

<bundles_post_ra>
// kernel: tpu_custom_call.1
= control target key start
LH: loop header
LB: loop body
LE: loop exit
PB: predicated region body
PF: predicated region fallthrough
CT: control target
= control target key end

     0   :  { %s5030_s12 = smov [#allocation4]   ;;  %s5922_s0 = inlined_call_operand.hbm [shape: s32[2], index: 0, kind: input, shape index: {}]   ;;  %s5923_s1 = inlined_call_operand.hbm [shape: bf16[8,1024], index: 1, kind: input, shape index: {}]   ;;  %s5924_s2 = inlined_call_operand.hbm [shape: bf16[1024,2048], index: 2, kind: input, shape index: {}]   ;;  %s5925_s3 = inlined_call_operand.hbm [shape: bf16[8,2048], index: 3, kind: output, shape index: {}]  }
   0x1   :  { %9 = dma.hbm_to_smem %s5922_s0, 16, %s5030_s12, [#allocation3] }
   0x2   :  { %4980 = dma.done.wait [#allocation3], 16 }
   0x3   :  { %4981 = vsyncadd [#allocation3], 4294967280 }
   0x4   :  { %11 = sfence }
   0x5   :  { %12 = vsyncpa [#allocation6], 0 }
   0x6   :  { %14 = vsyncpa [#allocation6 + $0x1], 0 }
   0x7   :  { %15 = vsyncpa [#allocation9], 0 }
   0x8   :  { %17 = vsyncpa [#allocation9 + $0x1], 0 }
   0x9   :  { %18 = vsyncpa [#allocation7], 0 }
   0xa   :  { %20 = vsyncpa [#allocation7 + $0x1], 0  ;;  %s5060_s15 = smov 0   ;;  %s5062_s16 = smov 0  }
   0xb   :  { %s5064_s17 = smov 0   ;;  %s5066_s18 = smov 0  }
   0xc   :  { %s5068_s19 = smov 0   ;;  %s5070_s0 = smov 0  }
   0xd   :  { %s5072_s20 = smov 0   ;;  %s5074_s21 = smov 0  }
   0xe   :  { %s5076_s22 = smov 0  }
   0xf LB: > { %5937 = sst [smem:[#allocation17_spill]] %s5016_s0  ;;  %s4197_s23 = sadd.s32 4294967295, %s5028_s22   ;;  %s5028_s22 = sphi %s5076_s22, %s26_s22   ;;  %s5024_s21 = sphi %s5074_s21, %s5967_s21   ;;  %s5020_s20 = sphi %s5072_s20, %s5966_s20   ;;  %s5016_s0 = sphi %s5070_s0, %s5965_s0   ;;  %s5012_s19 = sphi %s5068_s19, %s5972_s19   ;;  %s5008_s18 = sphi %s5066_s18, %s5971_s18   ;;  %s5004_s17 = sphi %s5064_s17, %s5970_s17   ;;  %s5000_s16 = sphi %s5062_s16, %s5969_s16   ;;  %s4996_s15 = sphi %s5060_s15, %s5968_s15  }
  0x10   : > { %5938 = sst [smem:[#allocation18_spill]] %s5024_s21  ;;  %s4198_s24 = sadd.s32 4294967294, %s5028_s22  }
  0x11   : > { %5939 = sst [smem:[#allocation19_spill]] %s5028_s22  ;;  %s38_s25 = sadd.s32 1, %s5024_s21 }
  0x12   : > { %s42_s26 = sld [smem:[#allocation4 + %s5024_s21]]  ;;  %p40_p0 = scmp.ge.s32.totalorder %s38_s25, 2 }
  0x13   : > { %s49_s27 = sadd.s32 1, %s5016_s0  ;;  %p56_p1 = scmp.ne.s32.totalorder %s5016_s0, %s5012_s19 }
  0x14   : > { %p57_p2 = scmp.eq.s32.totalorder %s5028_s22, 0  ;;  %s5974_s25 = smov (%p40_p0, %s38_s25), 0 }
  0x15   : > { %5940 = sst [smem:[#allocation20_spill]] %s5974_s25  ;;  %p62_p4 = scmp.ne.s32.totalorder %s5012_s19, %s5008_s18 }
  0x16   : > { %p5115_p3 = por %p57_p2, %p56_p1  ;;  %s44_s29 = sld [smem:[#allocation4 + %s5974_s25]] }
  0x17   : > { %p63_p5 = scmp.eq.s32.totalorder %s4197_s23, 0  ;;  %s73_s30 = ssub.s32 %s5024_s21, %s5974_s25 }
  0x18   : > { %s77_s4 = sadd.s32 1, %s5004_s17  ;;  %p75_p7 = scmp.eq.s32.totalorder %s73_s30, 0 }
  0x19   : > { %p5124_p6 = por %p63_p5, %p62_p4  ;;  %p84_p8 = scmp.ne.s32.totalorder %s5004_s17, %s5000_s16 }
  0x1a   : > { %p90_p9 = scmp.ne.s32.totalorder %s5000_s16, %s4996_s15  ;;  %p114_p12 = scmp.eq.s32.totalorder %s4197_s23, 1 }
  0x1b   : > { %s5942_s5 = scalar_select %p5124_p6, 1, 0 }
  0x1c   : > { %s5133_s6 = scalar_select %p75_p7, %s5004_s17, %s77_s4  }
  0x1d   : > { %p5137_p10 = por %p84_p8, %p57_p2  ;;  %p5141_p11 = por %p90_p9, %p63_p5 }
  0x1e   : > { %5943 = sst [smem:[#allocation21_spill]] %s5133_s6  ;;  %s46_s9 = ssub.s32 %s42_s26, %s44_s29 }
  0x1f   : > { %s5945_s8 = scalar_select %p5141_p11, 1, 0 }
  0x20   : > { %p47_p13 = scmp.eq.s32.totalorder %s46_s9, 0  ;;  %p120_p0 = scmp.eq.s32.totalorder %s4198_s24, 1 }
  0x21   : > { %p5145_p1 = por %p114_p12, %p84_p8  ;;  %p4768_p5 = scmp.lt.s32.totalorder %s5028_s22, 2 }
  0x22   : > { %s5151_s11 = scalar_select %p47_p13, %s5016_s0, %s49_s27  }
  0x23   : > { %s5946_s10 = scalar_select %p5145_p1, 1, 0 }
  0x24   : > { %5947 = sst [smem:[#allocation22_spill]] %s5151_s11  ;;  %p5153_p4 = por %p120_p0, %p90_p9 }
  0x25   : > { %s140_s13 = sand.u32 1, %s5016_s0   ;;  %p4207_p7 = scmp.ge.s32.totalorder %s5028_s22, 1 }
  0x26   : > { %s5948_s12 = scalar_select %p5153_p4, 1, 0 }
  0x27   : > { %s4201_s14 = sshll.u32 %s140_s13, 5  ;;  %p5164_p8 = pnand %p4768_p5, %p5115_p3 }
  0x28   : > { %5949 = sst [smem:[#allocation23_spill]] %s5948_s12  ;;  %s144_s26 = scalar_lea.vmem [#allocation5], %s4201_s14 }
  0x29   : > { %s4747_s23 = scalar_select %p5115_p3, [#allocation4], [#allocation11] }
  0x2a   : > { %s4748_s24 = scalar_select %p5115_p3, %s5024_s21, 0 }
  0x2b   : > { %s5976_s23 = smov (!%p4768_p5, %s4747_s23), [#allocation12]  ;;  %s154_s27 = sshll.u32 %s144_s26, 4  ;;  %s5177_s27 = int_to_ptr.vmem [resolvable:$true] %s154_s27 }
  0x2c   : > { %s5978_s24 = smov (!%p4768_p5, %s4748_s24), 0  ;;  %p5183_p9 = pnand %p4768_p5, %p5137_p10 }
  0x2d   : > { %s145_s29 = sld [smem:[%s5976_s23 + %s5978_s24]]  ;;  %p183_p12 = scmp.lt.s32.totalorder %s5028_s22, 3 }
  0x2e   : > { %s5951_s30 = scalar_select %p5183_p9, 1, 0 }
  0x2f   : > { %s5932_s4 = sand.u32 1, %s5004_s17   ;;  %s4741_s28 = sshll.u32 %s5024_s21, 9 }
  0x30   : > { %p5192_p3 = pnand %p4207_p7, %p183_p12  ;;  %s4204_s14 = sshll.u32 %s5932_s4, 12 }
  0x31   : > { %s5201_s7 = scalar_lea.hbm %s5924_s2, %s4741_s28  ;;  %s165_s25 = scalar_lea.vmem [#allocation8], %s4204_s14 }
  0x32   : > { %s5952_s9 = scalar_select %p5192_p3, 1, 0 }
  0x33   : > { %s4740_s26 = sshll.u32 %s145_s29, 9  ;;  %s175_s11 = sshll.u32 %s165_s25, 4  ;;  %s5206_s11 = int_to_ptr.vmem [resolvable:$true] %s175_s11 }
  0x34   : > { %s152_s12 = scalar_lea.hbm %s5923_s1, %s4740_s26  ;;  %s141_s21 = scalar_lea.sflag [#allocation6], %s140_s13 }
  0x35   : > { %s4862_s22 = scalar_lea.hbm %s152_s12, 512  ;;  %p4864_p13 = pneg %p5164_p8 }
  0x36   : > { %p4863_p10 = scmp.ne.s32.totalorder %s152_s12, %s4862_s22  ;;  %s4867_s28 = scalar_lea.hbm %s5923_s1, 512 }
  0x37   : > { %p4868_p7 = scmp.lt.s32.totalorder %s152_s12, %s5923_s1  ;;  %p4869_p12 = scmp.lt.s32.totalorder %s4867_s28, %s4862_s22 }
  0x38   : > { %p4865_p0 = pnand %p4864_p13, %p4863_p10 }
  0x39   : > { %p4870_p2 = por %p4869_p12, %p4868_p7 }
  0x3a   : > { %p4866_p5 = pneg %p4865_p0 }
  0x3c   : > { %p4871_p4 = pnand %p4870_p2, %p4866_p5 }
  0x3e   : > { %4874 = shalt.err (!%p4871_p4)
}
  0x3f   : > { %s4875_s0 = scalar_lea.vmem %s5177_s27, 512  ;;  %s5031_s25 = smov [#allocation5]  }
  0x40   : > { %p4876_p1 = scmp.ne.s32.totalorder %s5177_s27, %s4875_s0  ;;  %s4880_s6 = sshll.u32 %s5031_s25, 4  ;;  %s4881_s6 = int_to_ptr.vmem [resolvable:$false] %s4880_s6 }
  0x41   : > { %s4882_s13 = scalar_lea.vmem %s4881_s6, 1024  ;;  %p4883_p0 = scmp.lt.s32.totalorder %s5177_s27, %s4881_s6 }
  0x42   : > { %p4878_p11 = pnand %p4876_p1, %p4864_p13  ;;  %p4884_p6 = scmp.lt.s32.totalorder %s4882_s13, %s4875_s0 }
  0x44   : > { %p4879_p10 = pneg %p4878_p11  ;;  %p4885_p3 = por %p4884_p6, %p4883_p0 }
  0x46   : > { %p4886_p9 = pnand %p4885_p3, %p4879_p10 }
  0x48   : > { %4889 = shalt.err (!%p4886_p9)
}
  0x49   : > { %4760 = dma.hbm_to_vmem [thread:$0]  (!%p5164_p8), %s152_s12, 512, %s5177_s27, %s141_s21  }
  0x4a   : > { %s5953_s22 = sand.u32 1, %s5004_s17   ;;  %p5954_p11 = scmp.ne.s32.totalorder %s5951_s30, 0 }
  0x4b   : > { %s162_s4 = scalar_lea.sflag [#allocation9], %s5953_s22  ;;  %s4903_s24 = scalar_lea.vmem %s5206_s11, 65536 }
  0x4c   : > { %p4892_p1 = pneg %p5954_p11  ;;  %p4904_p2 = scmp.ne.s32.totalorder %s5206_s11, %s4903_s24 }
  0x4d   : > { %s5032_s26 = smov [#allocation8]  }
  0x4e   : > { %p4906_p4 = pnand %p4904_p2, %p4892_p1  ;;  %s4908_s23 = sshll.u32 %s5032_s26, 4  ;;  %s4909_s23 = int_to_ptr.vmem [resolvable:$false] %s4908_s23 }
  0x4f   : > { %s4910_s28 = scalar_lea.vmem %s4909_s23, 131072  ;;  %p4911_p6 = scmp.lt.s32.totalorder %s5206_s11, %s4909_s23 }
  0x50   : > { %p4907_p13 = pneg %p4906_p4  ;;  %p4912_p9 = scmp.lt.s32.totalorder %s4910_s28, %s4903_s24 }
  0x52   : > { %p4913_p3 = por %p4912_p9, %p4911_p6 }
  0x54   : > { %p4914_p5 = pnand %p4913_p3, %p4907_p13 }
  0x56   : > { %4917 = shalt.err (!%p4914_p5)
}
  0x57   : > { %s5033_s18 = smov 1024   ;;  %s5034_s21 = smov 512  }
  0x58   : > { %s5035_s12 = smov 32   ;;  %p5955_p8 = scmp.ne.s32.totalorder %s5952_s9, 0 }
  0x59   : > { %4763 = dma.hbm_to_vmem [thread:$0]  (!%p5954_p11), %s5201_s7, 65536, %s5206_s11, %s162_s4, %s5033_s18, %s5034_s21, %s5035_s12  }
  0x5a   : > { %187 = sbr.rel (%p5955_p8) target bundleno = 831 (0x33f), region = 28  ;;  %s189_s27 = sand.u32 (!%p5955_p8), 1, %s5012_s19  }
  0x5b   : > { %s4208_s29 = sshll.u32 (!%p5955_p8), %s189_s27, 5  ;;  %s190_s14 = scalar_lea.sflag (!%p5955_p8), [#allocation6], %s189_s27 }
  0x5c   : > { %s5236_s0 = scalar_lea.vmem (!%p5955_p8), [#allocation5], %s4208_s29  ;;  %p5956_p7 = scmp.ne.s32.totalorder (!%p5955_p8), %s5942_s5, 0 }
  0x5f   : > { %4983 = dma.done.wait (%p5956_p7), %s190_s14, 512  }
  0x60   : > { %4985 = vsyncadd (%p5956_p7), %s190_s14, 4294966784  ;;  %s5243_s25 = sand.u32 1, %s5000_s16   ;;  %p5957_p12 = scmp.ne.s32.totalorder %s5945_s8, 0 }
  0x61   : > { %s4209_s11 = sshll.u32 %s5243_s25, 12  ;;  %s199_s30 = scalar_lea.sflag [#allocation9], %s5243_s25 }
  0x62   : > { %s5247_s9 = scalar_lea.vmem [#allocation8], %s4209_s11 }
  0x63   : > { %4987 = dma.done.wait (%p5957_p12), %s199_s30, 65536  }
  0x64   : > { %4989 = vsyncadd (%p5957_p12), %s199_s30, 4294901760  ;;  %v314_v0 = vld [vmem:[%s5247_s9 + $0x1c0] sm:$0xff]  ;;  %v5285_v54 = vld [vmem:[%s5236_s0 + $0x8] sm:$0xff]  ;;  %s4210_s5 = sshll.u32 %s5243_s25, 5  ;;  %s4746_s7 = sshll.u32 %s5020_s20, 9 }
  0x65   : > { %v318_v1 = vld [vmem:[%s5247_s9 + $0x1e0] sm:$0xff]  ;;  %v5295_v59 = vcombine.high %v5285_v54, %v5285_v54  ;;  %s5672_s8 = scalar_lea.vmem [#allocation10], %s4210_s5  ;;  %s4090_s4 = scalar_lea.hbm %s5925_s3, %s4746_s7 }
  0x66   : > { %v442_v2 = vld [vmem:[%s5247_s9 + $0x5c0] sm:$0xff]  ;;  %v4276_v3 = vcombine.high %v314_v0, %v318_v1  ;;  %v4275_v5 = vcombine.low %v314_v0, %v318_v1  ;;  %s4092_s6 = sshll.u32 %s5672_s8, 4  ;;  %s4078_s24 = scalar_lea.sflag [#allocation7], %s5243_s25  ;;  %s4093_s6 = int_to_ptr.vmem [resolvable:$true] %s4092_s6 }
  0x67   : > { %v446_v4 = vld [vmem:[%s5247_s9 + $0x5e0] sm:$0xff]  ;;  %3431 = vmatprep.mubr.bf16.mxu1 %v5295_v59  ;;  %s4918_s26 = scalar_lea.vmem %s4093_s6, 512  ;;  %p5958_p0 = scmp.ne.s32.totalorder %s5946_s10, 0 }
  0x68   : > { %v306_v6 = vld [vmem:[%s5247_s9 + $0x180] sm:$0xff]  ;;  %v4404_v8 = vcombine.high %v442_v2, %v446_v4  ;;  %v4403_v9 = vcombine.low %v442_v2, %v446_v4  ;;  %3358 = vmatprep.subr.bf16.mxu0 %v4276_v3  ;;  %p4919_p10 = scmp.ne.s32.totalorder %s4093_s6, %s4918_s26  ;;  %s5036_s20 = smov [#allocation10]  }
  0x69   : > { %v310_v7 = vld [vmem:[%s5247_s9 + $0x1a0] sm:$0xff]  ;;  %3359 = vmatpush1.bf16.msra.mxu0 %v4275_v5  ;;  %s4922_s23 = sshll.u32 %s5036_s20, 4  ;;  %s4923_s23 = int_to_ptr.vmem [resolvable:$false] %s4922_s23 }
  0x6a   : > { %v4268_v10 = vcombine.high %v306_v6, %v310_v7  ;;  %v434_v11 = vld [vmem:[%s5247_s9 + $0x580] sm:$0xff]  ;;  %3399 = vmatprep.subr.bf16.mxu1 %v4404_v8  ;;  %v4267_v18 = vcombine.low %v306_v6, %v310_v7  ;;  %p4920_p11 = pnand %p4919_p10, %p5958_p0  ;;  %s4924_s28 = scalar_lea.vmem %s4923_s23, 1024 }
  0x6b   : > { %v438_v12 = vld [vmem:[%s5247_s9 + $0x5a0] sm:$0xff]  ;;  %3400 = vmatpush1.bf16.msra.mxu1 %v4403_v9  ;;  %p4925_p2 = scmp.lt.s32.totalorder %s4093_s6, %s4923_s23  ;;  %p4926_p4 = scmp.lt.s32.totalorder %s4924_s28, %s4918_s26 }
  0x6c   : > { %v298_v13 = vld [vmem:[%s5247_s9 + $0x140] sm:$0xff]  ;;  %v4396_v14 = vcombine.high %v434_v11, %v438_v12  ;;  %3360 = vmatprep.subr.bf16.mxu0 %v4268_v10  ;;  %v4395_v19 = vcombine.low %v434_v11, %v438_v12  ;;  %p4921_p1 = pneg %p4920_p11 }
  0x6d   : > { %v302_v15 = vld [vmem:[%s5247_s9 + $0x160] sm:$0xff]  ;;  %3361 = vmatpush1.bf16.msra.mxu0 %v4267_v18  ;;  %p4927_p13 = por %p4926_p4, %p4925_p2 }
  0x6e   : > { %v426_v16 = vld [vmem:[%s5247_s9 + $0x540] sm:$0xff]  ;;  %v4260_v20 = vcombine.high %v298_v13, %v302_v15  ;;  %3401 = vmatprep.subr.bf16.mxu1 %v4396_v14  ;;  %v4259_v26 = vcombine.low %v298_v13, %v302_v15 }
  0x6f   : > { %v430_v17 = vld [vmem:[%s5247_s9 + $0x560] sm:$0xff]  ;;  %3402 = vmatpush1.bf16.msra.mxu1 %v4395_v19  ;;  %p4928_p6 = pnand %p4927_p13, %p4921_p1 }
  0x70   : > { %v4388_v21 = vcombine.high %v426_v16, %v430_v17  ;;  %v290_v22 = vld [vmem:[%s5247_s9 + $0x100] sm:$0xff]  ;;  %3362 = vmatprep.subr.bf16.mxu0 %v4260_v20  ;;  %v4387_v27 = vcombine.low %v426_v16, %v430_v17 }
  0x71   : > { %v294_v23 = vld [vmem:[%s5247_s9 + $0x120] sm:$0xff]  ;;  %3363 = vmatpush1.bf16.msra.mxu0 %v4259_v26 }
  0x72   : > { %v418_v24 = vld [vmem:[%s5247_s9 + $0x500] sm:$0xff]  ;;  %v4252_v28 = vcombine.high %v290_v22, %v294_v23  ;;  %3403 = vmatprep.subr.bf16.mxu1 %v4388_v21  ;;  %v4251_v34 = vcombine.low %v290_v22, %v294_v23 }
  0x73   : > { %v422_v25 = vld [vmem:[%s5247_s9 + $0x520] sm:$0xff]  ;;  %3404 = vmatpush1.bf16.msra.mxu1 %v4387_v27 }
  0x74   : > { %v4380_v29 = vcombine.high %v418_v24, %v422_v25  ;;  %v282_v30 = vld [vmem:[%s5247_s9 + $0xc0] sm:$0xff]  ;;  %3364 = vmatprep.subr.bf16.mxu0 %v4252_v28  ;;  %v4379_v35 = vcombine.low %v418_v24, %v422_v25 }
  0x75   : > { %v286_v31 = vld [vmem:[%s5247_s9 + $0xe0] sm:$0xff]  ;;  %3365 = vmatpush1.bf16.msra.mxu0 %v4251_v34 }
  0x76   : > { %v410_v32 = vld [vmem:[%s5247_s9 + $0x4c0] sm:$0xff]  ;;  %v4244_v36 = vcombine.high %v282_v30, %v286_v31  ;;  %3405 = vmatprep.subr.bf16.mxu1 %v4380_v29  ;;  %v4243_v42 = vcombine.low %v282_v30, %v286_v31 }
  0x77   : > { %v414_v33 = vld [vmem:[%s5247_s9 + $0x4e0] sm:$0xff]  ;;  %3406 = vmatpush1.bf16.msra.mxu1 %v4379_v35 }
  0x78   : > { %v4372_v37 = vcombine.high %v410_v32, %v414_v33  ;;  %v274_v38 = vld [vmem:[%s5247_s9 + $0x80] sm:$0xff]  ;;  %3366 = vmatprep.subr.bf16.mxu0 %v4244_v36  ;;  %v4371_v43 = vcombine.low %v410_v32, %v414_v33 }
  0x79   : > { %v278_v39 = vld [vmem:[%s5247_s9 + $0xa0] sm:$0xff]  ;;  %3367 = vmatpush1.bf16.msra.mxu0 %v4243_v42 }
  0x7a   : > { %v402_v40 = vld [vmem:[%s5247_s9 + $0x480] sm:$0xff]  ;;  %v4236_v44 = vcombine.high %v274_v38, %v278_v39  ;;  %3407 = vmatprep.subr.bf16.mxu1 %v4372_v37  ;;  %v4235_v50 = vcombine.low %v274_v38, %v278_v39 }
  0x7b   : > { %v406_v41 = vld [vmem:[%s5247_s9 + $0x4a0] sm:$0xff]  ;;  %3408 = vmatpush1.bf16.msra.mxu1 %v4371_v43 }
  0x7c   : > { %v4364_v45 = vcombine.high %v402_v40, %v406_v41  ;;  %v266_v46 = vld [vmem:[%s5247_s9 + $0x40] sm:$0xff]  ;;  %3368 = vmatprep.subr.bf16.mxu0 %v4236_v44  ;;  %v4363_v51 = vcombine.low %v402_v40, %v406_v41 }
  0x7d   : > { %v270_v47 = vld [vmem:[%s5247_s9 + $0x60] sm:$0xff]  ;;  %3369 = vmatpush1.bf16.msra.mxu0 %v4235_v50 }
  0x7e   : > { %v394_v48 = vld [vmem:[%s5247_s9 + $0x440] sm:$0xff]  ;;  %v4228_v52 = vcombine.high %v266_v46, %v270_v47  ;;  %3409 = vmatprep.subr.bf16.mxu1 %v4364_v45  ;;  %v4227_v62 = vcombine.low %v266_v46, %v270_v47 }
  0x7f   : > { %v398_v49 = vld [vmem:[%s5247_s9 + $0x460] sm:$0xff]  ;;  %3410 = vmatpush1.bf16.msra.mxu1 %v4363_v51 }
  0x80   : > { %v5282_v53 = vld [vmem:[%s5236_s0] sm:$0xff]  ;;  %v4356_v55 = vcombine.high %v394_v48, %v398_v49  ;;  %3370 = vmatprep.subr.bf16.mxu0 %v4228_v52  ;;  %v4355_v63 = vcombine.low %v394_v48, %v398_v49 }
  0x81   : > { %v258_v56 = vld [vmem:[%s5247_s9] sm:$0xff]  ;;  %v5291_v58 = vcombine.high %v5282_v53, %v5282_v53  ;;  %3371 = vmatpush1.bf16.msra.mxu0 %v4227_v62 }
  0x82   : > { %v262_v57 = vld [vmem:[%s5247_s9 + $0x20] sm:$0xff]  ;;  %3411 = vmatprep.subr.bf16.mxu1 %v4356_v55 }
  0x83   : > { %v386_v60 = vld [vmem:[%s5247_s9 + $0x400] sm:$0xff]  ;;  %3390 = vmatprep.mubr.bf16.mxu0 %v5291_v58  ;;  %v4220_v0 = vcombine.high %v258_v56, %v262_v57  ;;  %v4219_v6 = vcombine.low %v258_v56, %v262_v57  ;;  %3412 = vmatpush1.bf16.msra.mxu1 %v4355_v63 }
  0x84   : > { %v390_v61 = vld [vmem:[%s5247_s9 + $0x420] sm:$0xff] }
  0x85   : > { %v4348_v1 = vcombine.high %v386_v60, %v390_v61  ;;  %v378_v2 = vld [vmem:[%s5247_s9 + $0x3c0] sm:$0xff]  ;;  %3372 = vmatprep.subr.bf16.mxu0 %v4220_v0  ;;  %v4347_v7 = vcombine.low %v386_v60, %v390_v61 }
  0x86   : > { %v382_v3 = vld [vmem:[%s5247_s9 + $0x3e0] sm:$0xff]  ;;  %3373 = vmatpush1.bf16.msra.mxu0 %v4219_v6 }
  0x87   : > { %v506_v4 = vld [vmem:[%s5247_s9 + $0x7c0] sm:$0xff]  ;;  %v4340_v8 = vcombine.high %v378_v2, %v382_v3  ;;  %3413 = vmatprep.subr.bf16.mxu1 %v4348_v1  ;;  %v4339_v14 = vcombine.low %v378_v2, %v382_v3 }
  0x88   : > { %v510_v5 = vld [vmem:[%s5247_s9 + $0x7e0] sm:$0xff]  ;;  %3414 = vmatpush1.bf16.msra.mxu1 %v4347_v7 }
  0x89   : > { %v4468_v9 = vcombine.high %v506_v4, %v510_v5  ;;  %v370_v10 = vld [vmem:[%s5247_s9 + $0x380] sm:$0xff]  ;;  %3374 = vmatprep.subr.bf16.mxu0 %v4340_v8  ;;  %v4467_v15 = vcombine.low %v506_v4, %v510_v5 }
  0x8a   : > { %v374_v11 = vld [vmem:[%s5247_s9 + $0x3a0] sm:$0xff]  ;;  %3375 = vmatpush2.bf16.msra.mxu0 %v4339_v14 }
  0x8b   : > { %v498_v12 = vld [vmem:[%s5247_s9 + $0x780] sm:$0xff]  ;;  %v4332_v16 = vcombine.high %v370_v10, %v374_v11  ;;  %3415 = vmatprep.subr.bf16.mxu1 %v4468_v9  ;;  %v4331_v22 = vcombine.low %v370_v10, %v374_v11 }
  0x8c   : > { %v502_v13 = vld [vmem:[%s5247_s9 + $0x7a0] sm:$0xff]  ;;  %3416 = vmatpush2.bf16.msra.mxu1 %v4467_v15 }
  0x8d   : > { %v4460_v17 = vcombine.high %v498_v12, %v502_v13  ;;  %v362_v18 = vld [vmem:[%s5247_s9 + $0x340] sm:$0xff]  ;;  %3376 = vmatprep.subr.bf16.mxu0 %v4332_v16  ;;  %v4459_v23 = vcombine.low %v498_v12, %v502_v13  ;;  %v5341_v16 = vcombine.low %v5282_v53, %v5282_v53 }
  0x8e   : > { %v366_v19 = vld [vmem:[%s5247_s9 + $0x360] sm:$0xff]  ;;  %3377 = vmatpush2.bf16.msra.mxu0 %v4331_v22  ;;  %v5353_v22 = vld [vmem:[%s5236_s0 + $0x18] sm:$0xff] }
  0x8f   : > { %v490_v20 = vld [vmem:[%s5247_s9 + $0x740] sm:$0xff]  ;;  %v4324_v24 = vcombine.high %v362_v18, %v366_v19  ;;  %3417 = vmatprep.subr.bf16.mxu1 %v4460_v17  ;;  %v4323_v30 = vcombine.low %v362_v18, %v366_v19  ;;  %v5346_v19 = vld [vmem:[%s5236_s0 + $0x10] sm:$0xff] }
  0x90   : > { %v494_v21 = vld [vmem:[%s5247_s9 + $0x760] sm:$0xff]  ;;  %3418 = vmatpush2.bf16.msra.mxu1 %v4459_v23 }
  0x91   : > { %v4452_v25 = vcombine.high %v490_v20, %v494_v21  ;;  %v354_v26 = vld [vmem:[%s5247_s9 + $0x300] sm:$0xff]  ;;  %3378 = vmatprep.subr.bf16.mxu0 %v4324_v24  ;;  %v4451_v31 = vcombine.low %v490_v20, %v494_v21  ;;  %v5350_v20 = vcombine.low %v5285_v54, %v5285_v54 }
  0x92   : > { %v358_v27 = vld [vmem:[%s5247_s9 + $0x320] sm:$0xff]  ;;  %3379 = vmatpush2.bf16.msra.mxu0 %v4323_v30 }
  0x93   : > { %v482_v28 = vld [vmem:[%s5247_s9 + $0x700] sm:$0xff]  ;;  %v4316_v32 = vcombine.high %v354_v26, %v358_v27  ;;  %3419 = vmatprep.subr.bf16.mxu1 %v4452_v25  ;;  %v4315_v38 = vcombine.low %v354_v26, %v358_v27  ;;  %v5359_v27 = vcombine.high %v5346_v19, %v5346_v19 }
  0x94   : > { %v486_v29 = vld [vmem:[%s5247_s9 + $0x720] sm:$0xff]  ;;  %3420 = vmatpush2.bf16.msra.mxu1 %v4451_v31 }
  0x95   : > { %v4444_v33 = vcombine.high %v482_v28, %v486_v29  ;;  %v346_v34 = vld [vmem:[%s5247_s9 + $0x2c0] sm:$0xff]  ;;  %3380 = vmatprep.subr.bf16.mxu0 %v4316_v32  ;;  %v4443_v39 = vcombine.low %v482_v28, %v486_v29  ;;  %v5366_v29 = vcombine.high %v5353_v22, %v5353_v22 }
  0x96   : > { %v350_v35 = vld [vmem:[%s5247_s9 + $0x2e0] sm:$0xff]  ;;  %3381 = vmatpush2.bf16.msra.mxu0 %v4315_v38 }
  0x97   : > { %v474_v36 = vld [vmem:[%s5247_s9 + $0x6c0] sm:$0xff]  ;;  %v4308_v40 = vcombine.high %v346_v34, %v350_v35  ;;  %3421 = vmatprep.subr.bf16.mxu1 %v4444_v33  ;;  %v4307_v46 = vcombine.low %v346_v34, %v350_v35 }
  0x98   : > { %v478_v37 = vld [vmem:[%s5247_s9 + $0x6e0] sm:$0xff]  ;;  %3422 = vmatpush2.bf16.msra.mxu1 %v4443_v39 }
  0x99   : > { %v4436_v41 = vcombine.high %v474_v36, %v478_v37  ;;  %v338_v42 = vld [vmem:[%s5247_s9 + $0x280] sm:$0xff]  ;;  %3382 = vmatprep.subr.bf16.mxu0 %v4308_v40  ;;  %v4435_v47 = vcombine.low %v474_v36, %v478_v37 }
  0x9a   : > { %v342_v43 = vld [vmem:[%s5247_s9 + $0x2a0] sm:$0xff]  ;;  %3383 = vmatpush2.bf16.msra.mxu0 %v4307_v46 }
  0x9b   : > { %v466_v44 = vld [vmem:[%s5247_s9 + $0x680] sm:$0xff]  ;;  %v4300_v48 = vcombine.high %v338_v42, %v342_v43  ;;  %3423 = vmatprep.subr.bf16.mxu1 %v4436_v41  ;;  %v4299_v56 = vcombine.low %v338_v42, %v342_v43 }
  0x9c   : > { %v470_v45 = vld [vmem:[%s5247_s9 + $0x6a0] sm:$0xff]  ;;  %3424 = vmatpush2.bf16.msra.mxu1 %v4435_v47 }
  0x9d   : > { %v4428_v49 = vcombine.high %v466_v44, %v470_v45  ;;  %v330_v50 = vld [vmem:[%s5247_s9 + $0x240] sm:$0xff]  ;;  %3384 = vmatprep.subr.bf16.mxu0 %v4300_v48  ;;  %v4427_v57 = vcombine.low %v466_v44, %v470_v45 }
  0x9e   : > { %v334_v51 = vld [vmem:[%s5247_s9 + $0x260] sm:$0xff]  ;;  %3385 = vmatpush2.bf16.msra.mxu0 %v4299_v56 }
  0x9f   : > { %v458_v52 = vld [vmem:[%s5247_s9 + $0x640] sm:$0xff]  ;;  %v4292_v60 = vcombine.high %v330_v50, %v334_v51  ;;  %3425 = vmatprep.subr.bf16.mxu1 %v4428_v49  ;;  %v4291_v2 = vcombine.low %v330_v50, %v334_v51 }
  0xa0   : > { %v462_v55 = vld [vmem:[%s5247_s9 + $0x660] sm:$0xff]  ;;  %3426 = vmatpush2.bf16.msra.mxu1 %v4427_v57 }
  0xa1   : > { %v4420_v61 = vcombine.high %v458_v52, %v462_v55  ;;  %v322_v62 = vld [vmem:[%s5247_s9 + $0x200] sm:$0xff]  ;;  %3386 = vmatprep.subr.bf16.mxu0 %v4292_v60  ;;  %v4419_v3 = vcombine.low %v458_v52, %v462_v55 }
  0xa2   : > { %v326_v63 = vld [vmem:[%s5247_s9 + $0x220] sm:$0xff]  ;;  %3387 = vmatpush2.bf16.msra.mxu0 %v4291_v2 }
  0xa3   : > { %v450_v0 = vld [vmem:[%s5247_s9 + $0x600] sm:$0xff]  ;;  %v4284_v4 = vcombine.high %v322_v62, %v326_v63  ;;  %3427 = vmatprep.subr.bf16.mxu1 %v4420_v61  ;;  %v4283_v10 = vcombine.low %v322_v62, %v326_v63 }
  0xa4   : > { %v454_v1 = vld [vmem:[%s5247_s9 + $0x620] sm:$0xff]  ;;  %3428 = vmatpush2.bf16.msra.mxu1 %v4419_v3 }
  0xa5   : > { %v4412_v5 = vcombine.high %v450_v0, %v454_v1  ;;  %v570_v6 = vld [vmem:[%s5247_s9 + $0x9c0] sm:$0xff]  ;;  %3388 = vmatprep.subr.bf16.mxu0 %v4284_v4  ;;  %v4411_v11 = vcombine.low %v450_v0, %v454_v1 }
  0xa6   : > { %v574_v7 = vld [vmem:[%s5247_s9 + $0x9e0] sm:$0xff]  ;;  %3389 = vmatpush2.bf16.msra.mxu0 %v4283_v10 }
  0xa7   : > { %v698_v8 = vld [vmem:[%s5247_s9 + $0xdc0] sm:$0xff]  ;;  %v4532_v12 = vcombine.high %v570_v6, %v574_v7  ;;  %3429 = vmatprep.subr.bf16.mxu1 %v4412_v5  ;;  %v4531_v21 = vcombine.low %v570_v6, %v574_v7 }
  0xa8   : > { %v702_v9 = vld [vmem:[%s5247_s9 + $0xde0] sm:$0xff]  ;;  %3430 = vmatpush2.bf16.msra.mxu1 %v4411_v11 }
  0xa9   : > { %v4660_v13 = vcombine.high %v698_v8, %v702_v9  ;;  %v562_v14 = vld [vmem:[%s5247_s9 + $0x980] sm:$0xff]  ;;  %3440 = vmatprep.subr.bf16.mxu0 %v4532_v12  ;;  %v4659_v23 = vcombine.low %v698_v8, %v702_v9  ;;  %3391 = vmatmul.mubr.bf16.vlgmr.msra.gmra.mxu0 %v5341_v16 }
  0xaa   : > { %v566_v15 = vld [vmem:[%s5247_s9 + $0x9a0] sm:$0xff]  ;;  %3441 = vmatpush1.bf16.msra.mxu0 %v4531_v21  ;;  %3472 = vmatprep.mubr.bf16.mxu0 %v5359_v27 }
  0xab   : > { %v690_v17 = vld [vmem:[%s5247_s9 + $0xd80] sm:$0xff]  ;;  %v4524_v24 = vcombine.high %v562_v14, %v566_v15  ;;  %3481 = vmatprep.subr.bf16.mxu1 %v4660_v13  ;;  %3432 = vmatmul.mubr.bf16.vlgmr.msra.gmra.mxu1 %v5350_v20  ;;  %v4523_v30 = vcombine.low %v562_v14, %v566_v15 }
  0xac   : > { %v694_v18 = vld [vmem:[%s5247_s9 + $0xda0] sm:$0xff]  ;;  %3482 = vmatpush1.bf16.msra.mxu1 %v4659_v23  ;;  %3513 = vmatprep.mubr.bf16.mxu1 %v5366_v29 }
  0xad   : > { %v4652_v53 = vcombine.high %v690_v17, %v694_v18  ;;  %v554_v25 = vld [vmem:[%s5247_s9 + $0x940] sm:$0xff]  ;;  %3442 = vmatprep.subr.bf16.mxu0 %v4524_v24  ;;  %v4651_v31 = vcombine.low %v690_v17, %v694_v18 }
  0xae   : > { %v558_v26 = vld [vmem:[%s5247_s9 + $0x960] sm:$0xff]  ;;  %3443 = vmatpush1.bf16.msra.mxu0 %v4523_v30 }
  0xaf   : > { %v682_v54 = vld [vmem:[%s5247_s9 + $0xd40] sm:$0xff]  ;;  %v4516_v32 = vcombine.high %v554_v25, %v558_v26  ;;  %3483 = vmatprep.subr.bf16.mxu1 %v4652_v53  ;;  %v4515_v38 = vcombine.low %v554_v25, %v558_v26 }
  0xb0   : > { %v686_v28 = vld [vmem:[%s5247_s9 + $0xd60] sm:$0xff]  ;;  %3484 = vmatpush1.bf16.msra.mxu1 %v4651_v31 }
  0xb1   : > { %v4644_v33 = vcombine.high %v682_v54, %v686_v28  ;;  %v546_v34 = vld [vmem:[%s5247_s9 + $0x900] sm:$0xff]  ;;  %3444 = vmatprep.subr.bf16.mxu0 %v4516_v32  ;;  %v4643_v39 = vcombine.low %v682_v54, %v686_v28 }
  0xb2   : > { %v550_v35 = vld [vmem:[%s5247_s9 + $0x920] sm:$0xff]  ;;  %3445 = vmatpush1.bf16.msra.mxu0 %v4515_v38 }
  0xb3   : > { %v674_v36 = vld [vmem:[%s5247_s9 + $0xd00] sm:$0xff]  ;;  %v4508_v40 = vcombine.high %v546_v34, %v550_v35  ;;  %3485 = vmatprep.subr.bf16.mxu1 %v4644_v33  ;;  %v4507_v46 = vcombine.low %v546_v34, %v550_v35 }
  0xb4   : > { %v678_v37 = vld [vmem:[%s5247_s9 + $0xd20] sm:$0xff]  ;;  %3486 = vmatpush1.bf16.msra.mxu1 %v4643_v39 }
  0xb5   : > { %v4636_v41 = vcombine.high %v674_v36, %v678_v37  ;;  %v538_v42 = vld [vmem:[%s5247_s9 + $0x8c0] sm:$0xff]  ;;  %3446 = vmatprep.subr.bf16.mxu0 %v4508_v40  ;;  %v4635_v47 = vcombine.low %v674_v36, %v678_v37 }
  0xb6   : > { %v542_v43 = vld [vmem:[%s5247_s9 + $0x8e0] sm:$0xff]  ;;  %3447 = vmatpush1.bf16.msra.mxu0 %v4507_v46 }
  0xb7   : > { %v666_v44 = vld [vmem:[%s5247_s9 + $0xcc0] sm:$0xff]  ;;  %v4500_v48 = vcombine.high %v538_v42, %v542_v43  ;;  %3487 = vmatprep.subr.bf16.mxu1 %v4636_v41  ;;  %v4499_v56 = vcombine.low %v538_v42, %v542_v43 }
  0xb8   : > { %v670_v45 = vld [vmem:[%s5247_s9 + $0xce0] sm:$0xff]  ;;  %3488 = vmatpush1.bf16.msra.mxu1 %v4635_v47 }
  0xb9   : > { %v4628_v49 = vcombine.high %v666_v44, %v670_v45  ;;  %v530_v50 = vld [vmem:[%s5247_s9 + $0x880] sm:$0xff]  ;;  %3448 = vmatprep.subr.bf16.mxu0 %v4500_v48  ;;  %v4627_v57 = vcombine.low %v666_v44, %v670_v45 }
  0xba   : > { %v534_v51 = vld [vmem:[%s5247_s9 + $0x8a0] sm:$0xff]  ;;  %3449 = vmatpush1.bf16.msra.mxu0 %v4499_v56 }
  0xbb   : > { %v658_v52 = vld [vmem:[%s5247_s9 + $0xc80] sm:$0xff]  ;;  %v4492_v60 = vcombine.high %v530_v50, %v534_v51  ;;  %3489 = vmatprep.subr.bf16.mxu1 %v4628_v49  ;;  %v4491_v2 = vcombine.low %v530_v50, %v534_v51 }
  0xbc   : > { %v662_v55 = vld [vmem:[%s5247_s9 + $0xca0] sm:$0xff]  ;;  %3490 = vmatpush1.bf16.msra.mxu1 %v4627_v57 }
  0xbd   : > { %v4620_v61 = vcombine.high %v658_v52, %v662_v55  ;;  %v522_v62 = vld [vmem:[%s5247_s9 + $0x840] sm:$0xff]  ;;  %3450 = vmatprep.subr.bf16.mxu0 %v4492_v60  ;;  %v4619_v3 = vcombine.low %v658_v52, %v662_v55 }
  0xbe   : > { %v526_v63 = vld [vmem:[%s5247_s9 + $0x860] sm:$0xff]  ;;  %3451 = vmatpush1.bf16.msra.mxu0 %v4491_v2 }
  0xbf   : > { %v650_v0 = vld [vmem:[%s5247_s9 + $0xc40] sm:$0xff]  ;;  %v4484_v4 = vcombine.high %v522_v62, %v526_v63  ;;  %3491 = vmatprep.subr.bf16.mxu1 %v4620_v61  ;;  %v4483_v10 = vcombine.low %v522_v62, %v526_v63 }
  0xc0   : > { %v654_v1 = vld [vmem:[%s5247_s9 + $0xc60] sm:$0xff]  ;;  %3492 = vmatpush1.bf16.msra.mxu1 %v4619_v3 }
  0xc1   : > { %v4612_v5 = vcombine.high %v650_v0, %v654_v1  ;;  %v514_v6 = vld [vmem:[%s5247_s9 + $0x800] sm:$0xff]  ;;  %3452 = vmatprep.subr.bf16.mxu0 %v4484_v4  ;;  %v4611_v11 = vcombine.low %v650_v0, %v654_v1 }
  0xc2   : > { %v518_v7 = vld [vmem:[%s5247_s9 + $0x820] sm:$0xff]  ;;  %3453 = vmatpush1.bf16.msra.mxu0 %v4483_v10 }
  0xc3   : > { %v642_v8 = vld [vmem:[%s5247_s9 + $0xc00] sm:$0xff]  ;;  %v4476_v12 = vcombine.high %v514_v6, %v518_v7  ;;  %3493 = vmatprep.subr.bf16.mxu1 %v4612_v5  ;;  %v4475_v21 = vcombine.low %v514_v6, %v518_v7 }
  0xc4   : > { %v646_v9 = vld [vmem:[%s5247_s9 + $0xc20] sm:$0xff]  ;;  %3494 = vmatpush1.bf16.msra.mxu1 %v4611_v11 }
  0xc5   : > { %v4604_v13 = vcombine.high %v642_v8, %v646_v9  ;;  %v634_v14 = vld [vmem:[%s5247_s9 + $0xbc0] sm:$0xff]  ;;  %3454 = vmatprep.subr.bf16.mxu0 %v4476_v12  ;;  %v4603_v23 = vcombine.low %v642_v8, %v646_v9 }
  0xc6   : > { %v638_v15 = vld [vmem:[%s5247_s9 + $0xbe0] sm:$0xff]  ;;  %3455 = vmatpush1.bf16.msra.mxu0 %v4475_v21 }
  0xc7   : > { %v762_v17 = vld [vmem:[%s5247_s9 + $0xfc0] sm:$0xff]  ;;  %v4596_v24 = vcombine.high %v634_v14, %v638_v15  ;;  %3495 = vmatprep.subr.bf16.mxu1 %v4604_v13  ;;  %v4595_v30 = vcombine.low %v634_v14, %v638_v15 }
  0xc8   : > { %v766_v18 = vld [vmem:[%s5247_s9 + $0xfe0] sm:$0xff]  ;;  %3496 = vmatpush1.bf16.msra.mxu1 %v4603_v23 }
  0xc9   : > { %v4724_v53 = vcombine.high %v762_v17, %v766_v18  ;;  %v626_v25 = vld [vmem:[%s5247_s9 + $0xb80] sm:$0xff]  ;;  %3456 = vmatprep.subr.bf16.mxu0 %v4596_v24  ;;  %v4723_v31 = vcombine.low %v762_v17, %v766_v18 }
  0xca   : > { %v630_v26 = vld [vmem:[%s5247_s9 + $0xba0] sm:$0xff]  ;;  %3457 = vmatpush2.bf16.msra.mxu0 %v4595_v30 }
  0xcb   : > { %v754_v54 = vld [vmem:[%s5247_s9 + $0xf80] sm:$0xff]  ;;  %v4588_v32 = vcombine.high %v626_v25, %v630_v26  ;;  %3497 = vmatprep.subr.bf16.mxu1 %v4724_v53  ;;  %v4587_v38 = vcombine.low %v626_v25, %v630_v26  ;;  %v315_v25 = vld [vmem:[%s5247_s9 + $0x1c8] sm:$0xff] }
  0xcc   : > { %v758_v28 = vld [vmem:[%s5247_s9 + $0xfa0] sm:$0xff]  ;;  %3498 = vmatpush2.bf16.msra.mxu1 %v4723_v31  ;;  %v319_v26 = vld [vmem:[%s5247_s9 + $0x1e8] sm:$0xff] }
  0xcd   : > { %v4716_v33 = vcombine.high %v754_v54, %v758_v28  ;;  %v618_v34 = vld [vmem:[%s5247_s9 + $0xb40] sm:$0xff]  ;;  %3458 = vmatprep.subr.bf16.mxu0 %v4588_v32  ;;  %v4715_v39 = vcombine.low %v754_v54, %v758_v28  ;;  %v443_v54 = vld [vmem:[%s5247_s9 + $0x5c8] sm:$0xff]  ;;  %v4278_v32 = vcombine.high %v315_v25, %v319_v26 }
  0xce   : > { %v622_v35 = vld [vmem:[%s5247_s9 + $0xb60] sm:$0xff]  ;;  %3459 = vmatpush2.bf16.msra.mxu0 %v4587_v38  ;;  %v447_v28 = vld [vmem:[%s5247_s9 + $0x5e8] sm:$0xff] }
  0xcf   : > { %v746_v36 = vld [vmem:[%s5247_s9 + $0xf40] sm:$0xff]  ;;  %v4580_v40 = vcombine.high %v618_v34, %v622_v35  ;;  %3499 = vmatprep.subr.bf16.mxu1 %v4716_v33  ;;  %v4579_v46 = vcombine.low %v618_v34, %v622_v35  ;;  %v4406_v33 = vcombine.high %v443_v54, %v447_v28  ;;  %v307_v34 = vld [vmem:[%s5247_s9 + $0x188] sm:$0xff] }
  0xd0   : > { %v750_v37 = vld [vmem:[%s5247_s9 + $0xf60] sm:$0xff]  ;;  %3500 = vmatpush2.bf16.msra.mxu1 %v4715_v39  ;;  %v311_v35 = vld [vmem:[%s5247_s9 + $0x1a8] sm:$0xff]  ;;  %v5437_v39 = vcombine.low %v5353_v22, %v5353_v22 }
  0xd1   : > { %v4708_v41 = vcombine.high %v746_v36, %v750_v37  ;;  %v610_v42 = vld [vmem:[%s5247_s9 + $0xb00] sm:$0xff]  ;;  %3460 = vmatprep.subr.bf16.mxu0 %v4580_v40  ;;  %v4707_v47 = vcombine.low %v746_v36, %v750_v37  ;;  %v5431_v36 = vcombine.low %v5346_v19, %v5346_v19  ;;  %v435_v37 = vld [vmem:[%s5247_s9 + $0x588] sm:$0xff]  ;;  %v4277_v40 = vcombine.low %v315_v25, %v319_v26 }
  0xd2   : > { %v614_v43 = vld [vmem:[%s5247_s9 + $0xb20] sm:$0xff]  ;;  %3461 = vmatpush2.bf16.msra.mxu0 %v4579_v46  ;;  %v439_v38 = vld [vmem:[%s5247_s9 + $0x5a8] sm:$0xff]  ;;  %v4269_v22 = vcombine.low %v307_v34, %v311_v35 }
  0xd3   : > { %v738_v44 = vld [vmem:[%s5247_s9 + $0xf00] sm:$0xff]  ;;  %v4572_v48 = vcombine.high %v610_v42, %v614_v43  ;;  %3501 = vmatprep.subr.bf16.mxu1 %v4708_v41  ;;  %v4571_v56 = vcombine.low %v610_v42, %v614_v43  ;;  %v4405_v41 = vcombine.low %v443_v54, %v447_v28  ;;  %v4270_v42 = vcombine.high %v307_v34, %v311_v35  ;;  %v303_v19 = vld [vmem:[%s5247_s9 + $0x168] sm:$0xff] }
  0xd4   : > { %v742_v45 = vld [vmem:[%s5247_s9 + $0xf20] sm:$0xff]  ;;  %3502 = vmatpush2.bf16.msra.mxu1 %v4707_v47  ;;  %v4398_v43 = vcombine.high %v435_v37, %v439_v38  ;;  %v431_v46 = vld [vmem:[%s5247_s9 + $0x568] sm:$0xff]  ;;  %v4397_v47 = vcombine.low %v435_v37, %v439_v38 }
  0xd5   : > { %v4700_v49 = vcombine.high %v738_v44, %v742_v45  ;;  %v602_v50 = vld [vmem:[%s5247_s9 + $0xac0] sm:$0xff]  ;;  %3462 = vmatprep.subr.bf16.mxu0 %v4572_v48  ;;  %v4699_v57 = vcombine.low %v738_v44, %v742_v45  ;;  %v299_v44 = vld [vmem:[%s5247_s9 + $0x148] sm:$0xff] }
  0xd6   : > { %v606_v51 = vld [vmem:[%s5247_s9 + $0xae0] sm:$0xff]  ;;  %3463 = vmatpush2.bf16.msra.mxu0 %v4571_v56  ;;  %v427_v45 = vld [vmem:[%s5247_s9 + $0x548] sm:$0xff]  ;;  %v4262_v48 = vcombine.high %v299_v44, %v303_v19  ;;  %v4261_v56 = vcombine.low %v299_v44, %v303_v19 }
  0xd7   : > { %v730_v52 = vld [vmem:[%s5247_s9 + $0xec0] sm:$0xff]  ;;  %v4564_v60 = vcombine.high %v602_v50, %v606_v51  ;;  %3503 = vmatprep.subr.bf16.mxu1 %v4700_v49  ;;  %v4563_v2 = vcombine.low %v602_v50, %v606_v51  ;;  %v4390_v49 = vcombine.high %v427_v45, %v431_v46  ;;  %v291_v50 = vld [vmem:[%s5247_s9 + $0x108] sm:$0xff] }
  0xd8   : > { %v734_v55 = vld [vmem:[%s5247_s9 + $0xee0] sm:$0xff]  ;;  %3504 = vmatpush2.bf16.msra.mxu1 %v4699_v57  ;;  %v295_v51 = vld [vmem:[%s5247_s9 + $0x128] sm:$0xff]  ;;  %v4389_v57 = vcombine.low %v427_v45, %v431_v46 }
  0xd9   : > { %v4692_v61 = vcombine.high %v730_v52, %v734_v55  ;;  %v594_v62 = vld [vmem:[%s5247_s9 + $0xa80] sm:$0xff]  ;;  %3464 = vmatprep.subr.bf16.mxu0 %v4564_v60  ;;  %v4691_v3 = vcombine.low %v730_v52, %v734_v55  ;;  %v419_v52 = vld [vmem:[%s5247_s9 + $0x508] sm:$0xff]  ;;  %v4254_v60 = vcombine.high %v291_v50, %v295_v51 }
  0xda   : > { %v598_v63 = vld [vmem:[%s5247_s9 + $0xaa0] sm:$0xff]  ;;  %3465 = vmatpush2.bf16.msra.mxu0 %v4563_v2  ;;  %v423_v55 = vld [vmem:[%s5247_s9 + $0x528] sm:$0xff]  ;;  %v4253_v2 = vcombine.low %v291_v50, %v295_v51 }
  0xdb   : > { %v722_v0 = vld [vmem:[%s5247_s9 + $0xe80] sm:$0xff]  ;;  %v4556_v4 = vcombine.high %v594_v62, %v598_v63  ;;  %3505 = vmatprep.subr.bf16.mxu1 %v4692_v61  ;;  %v4555_v10 = vcombine.low %v594_v62, %v598_v63  ;;  %v4382_v61 = vcombine.high %v419_v52, %v423_v55  ;;  %v283_v62 = vld [vmem:[%s5247_s9 + $0xc8] sm:$0xff] }
  0xdc   : > { %v726_v1 = vld [vmem:[%s5247_s9 + $0xea0] sm:$0xff]  ;;  %3506 = vmatpush2.bf16.msra.mxu1 %v4691_v3  ;;  %v287_v63 = vld [vmem:[%s5247_s9 + $0xe8] sm:$0xff]  ;;  %v4381_v3 = vcombine.low %v419_v52, %v423_v55 }
  0xdd   : > { %v4684_v5 = vcombine.high %v722_v0, %v726_v1  ;;  %v586_v6 = vld [vmem:[%s5247_s9 + $0xa40] sm:$0xff]  ;;  %3466 = vmatprep.subr.bf16.mxu0 %v4556_v4  ;;  %v4683_v11 = vcombine.low %v722_v0, %v726_v1  ;;  %v411_v0 = vld [vmem:[%s5247_s9 + $0x4c8] sm:$0xff]  ;;  %v4246_v4 = vcombine.high %v283_v62, %v287_v63 }
  0xde   : > { %v590_v7 = vld [vmem:[%s5247_s9 + $0xa60] sm:$0xff]  ;;  %3467 = vmatpush2.bf16.msra.mxu0 %v4555_v10  ;;  %v415_v1 = vld [vmem:[%s5247_s9 + $0x4e8] sm:$0xff]  ;;  %v4245_v10 = vcombine.low %v283_v62, %v287_v63 }
  0xdf   : > { %v714_v8 = vld [vmem:[%s5247_s9 + $0xe40] sm:$0xff]  ;;  %v4548_v12 = vcombine.high %v586_v6, %v590_v7  ;;  %3507 = vmatprep.subr.bf16.mxu1 %v4684_v5  ;;  %v4547_v21 = vcombine.low %v586_v6, %v590_v7  ;;  %v4374_v5 = vcombine.high %v411_v0, %v415_v1  ;;  %v275_v6 = vld [vmem:[%s5247_s9 + $0x88] sm:$0xff] }
  0xe0   : > { %v718_v9 = vld [vmem:[%s5247_s9 + $0xe60] sm:$0xff]  ;;  %3508 = vmatpush2.bf16.msra.mxu1 %v4683_v11  ;;  %v279_v7 = vld [vmem:[%s5247_s9 + $0xa8] sm:$0xff]  ;;  %v4373_v11 = vcombine.low %v411_v0, %v415_v1 }
  0xe1   : > { %v4676_v13 = vcombine.high %v714_v8, %v718_v9  ;;  %v578_v14 = vld [vmem:[%s5247_s9 + $0xa00] sm:$0xff]  ;;  %3468 = vmatprep.subr.bf16.mxu0 %v4548_v12  ;;  %v4675_v23 = vcombine.low %v714_v8, %v718_v9  ;;  %v403_v8 = vld [vmem:[%s5247_s9 + $0x488] sm:$0xff]  ;;  %v4238_v12 = vcombine.high %v275_v6, %v279_v7 }
  0xe2   : > { %v582_v15 = vld [vmem:[%s5247_s9 + $0xa20] sm:$0xff]  ;;  %3469 = vmatpush2.bf16.msra.mxu0 %v4547_v21  ;;  %v407_v9 = vld [vmem:[%s5247_s9 + $0x4a8] sm:$0xff]  ;;  %v4237_v21 = vcombine.low %v275_v6, %v279_v7 }
  0xe3   : > { %v706_v17 = vld [vmem:[%s5247_s9 + $0xe00] sm:$0xff]  ;;  %v4540_v24 = vcombine.high %v578_v14, %v582_v15  ;;  %3509 = vmatprep.subr.bf16.mxu1 %v4676_v13  ;;  %v4539_v30 = vcombine.low %v578_v14, %v582_v15  ;;  %v4366_v13 = vcombine.high %v403_v8, %v407_v9  ;;  %v267_v14 = vld [vmem:[%s5247_s9 + $0x48] sm:$0xff] }
  0xe4   : > { %v710_v18 = vld [vmem:[%s5247_s9 + $0xe20] sm:$0xff]  ;;  %3510 = vmatpush2.bf16.msra.mxu1 %v4675_v23  ;;  %v271_v15 = vld [vmem:[%s5247_s9 + $0x68] sm:$0xff]  ;;  %v4365_v23 = vcombine.low %v403_v8, %v407_v9 }
  0xe5   : > { %v4668_v53 = vcombine.high %v706_v17, %v710_v18  ;;  %3470 = vmatprep.subr.bf16.mxu0 %v4540_v24  ;;  %v4667_v31 = vcombine.low %v706_v17, %v710_v18  ;;  %v395_v17 = vld [vmem:[%s5247_s9 + $0x448] sm:$0xff]  ;;  %v4230_v24 = vcombine.high %v267_v14, %v271_v15 }
  0xe6   : > { %3471 = vmatpush2.bf16.msra.mxu0 %v4539_v30  ;;  %v399_v18 = vld [vmem:[%s5247_s9 + $0x468] sm:$0xff]  ;;  %v4229_v30 = vcombine.low %v267_v14, %v271_v15 }
  0xe7   : > { %3511 = vmatprep.subr.bf16.mxu1 %v4668_v53  ;;  %3522 = vmatprep.subr.bf16.mxu0 %v4278_v32  ;;  %v4358_v53 = vcombine.high %v395_v17, %v399_v18  ;;  %v259_v25 = vld [vmem:[%s5247_s9 + $0x8] sm:$0xff] }
  0xe8   : > { %3512 = vmatpush2.bf16.msra.mxu1 %v4667_v31  ;;  %v263_v26 = vld [vmem:[%s5247_s9 + $0x28] sm:$0xff]  ;;  %v4357_v31 = vcombine.low %v395_v17, %v399_v18 }
  0xe9   : > { %3563 = vmatprep.subr.bf16.mxu1 %v4406_v33  ;;  %3473 = vmatmul.mubr.bf16.vlgmr.msra.gmra.mxu0 %v5431_v36  ;;  %v387_v54 = vld [vmem:[%s5247_s9 + $0x408] sm:$0xff]  ;;  %v4222_v32 = vcombine.high %v259_v25, %v263_v26 }
  0xea   : > { %3523 = vmatpush1.bf16.msra.mxu0 %v4277_v40  ;;  %3554 = vmatprep.mubr.bf16.mxu0 %v5291_v58  ;;  %v391_v28 = vld [vmem:[%s5247_s9 + $0x428] sm:$0xff]  ;;  %v4221_v40 = vcombine.low %v259_v25, %v263_v26 }
  0xeb   : > { %3514 = vmatmul.mubr.bf16.vlgmr.msra.gmra.mxu1 %v5437_v39  ;;  %3524 = vmatprep.subr.bf16.mxu0 %v4270_v42  ;;  %v4350_v33 = vcombine.high %v387_v54, %v391_v28  ;;  %v379_v34 = vld [vmem:[%s5247_s9 + $0x3c8] sm:$0xff] }
  0xec   : > { %3564 = vmatpush1.bf16.msra.mxu1 %v4405_v41  ;;  %3595 = vmatprep.mubr.bf16.mxu1 %v5295_v59  ;;  %v383_v35 = vld [vmem:[%s5247_s9 + $0x3e8] sm:$0xff]  ;;  %v4349_v41 = vcombine.low %v387_v54, %v391_v28 }
  0xed   : > { %3565 = vmatprep.subr.bf16.mxu1 %v4398_v43  ;;  %v507_v37 = vld [vmem:[%s5247_s9 + $0x7c8] sm:$0xff]  ;;  %v4342_v42 = vcombine.high %v379_v34, %v383_v35 }
  0xee   : > { %3525 = vmatpush1.bf16.msra.mxu0 %v4269_v22  ;;  %v511_v38 = vld [vmem:[%s5247_s9 + $0x7e8] sm:$0xff]  ;;  %v4341_v22 = vcombine.low %v379_v34, %v383_v35 }
  0xef   : > { %3526 = vmatprep.subr.bf16.mxu0 %v4262_v48  ;;  %v4470_v43 = vcombine.high %v507_v37, %v511_v38  ;;  %v371_v44 = vld [vmem:[%s5247_s9 + $0x388] sm:$0xff] }
  0xf0   : > { %3566 = vmatpush1.bf16.msra.mxu1 %v4397_v47  ;;  %v375_v19 = vld [vmem:[%s5247_s9 + $0x3a8] sm:$0xff]  ;;  %v4469_v47 = vcombine.low %v507_v37, %v511_v38 }
  0xf1   : > { %3567 = vmatprep.subr.bf16.mxu1 %v4390_v49  ;;  %v499_v45 = vld [vmem:[%s5247_s9 + $0x788] sm:$0xff]  ;;  %v4334_v48 = vcombine.high %v371_v44, %v375_v19 }
  0xf2   : > { %3527 = vmatpush1.bf16.msra.mxu0 %v4261_v56  ;;  %v503_v46 = vld [vmem:[%s5247_s9 + $0x7a8] sm:$0xff]  ;;  %v4333_v56 = vcombine.low %v371_v44, %v375_v19 }
  0xf3   : > { %3528 = vmatprep.subr.bf16.mxu0 %v4254_v60  ;;  %v4462_v49 = vcombine.high %v499_v45, %v503_v46  ;;  %v363_v50 = vld [vmem:[%s5247_s9 + $0x348] sm:$0xff] }
  0xf4   : > { %3568 = vmatpush1.bf16.msra.mxu1 %v4389_v57  ;;  %v367_v51 = vld [vmem:[%s5247_s9 + $0x368] sm:$0xff]  ;;  %v4461_v57 = vcombine.low %v499_v45, %v503_v46 }
  0xf5   : > { %3569 = vmatprep.subr.bf16.mxu1 %v4382_v61  ;;  %v491_v52 = vld [vmem:[%s5247_s9 + $0x748] sm:$0xff]  ;;  %v4326_v60 = vcombine.high %v363_v50, %v367_v51 }
  0xf6   : > { %3529 = vmatpush1.bf16.msra.mxu0 %v4253_v2  ;;  %v495_v55 = vld [vmem:[%s5247_s9 + $0x768] sm:$0xff]  ;;  %v4325_v2 = vcombine.low %v363_v50, %v367_v51 }
  0xf7   : > { %3530 = vmatprep.subr.bf16.mxu0 %v4246_v4  ;;  %v4454_v61 = vcombine.high %v491_v52, %v495_v55  ;;  %v355_v62 = vld [vmem:[%s5247_s9 + $0x308] sm:$0xff] }
  0xf8   : > { %3570 = vmatpush1.bf16.msra.mxu1 %v4381_v3  ;;  %v359_v63 = vld [vmem:[%s5247_s9 + $0x328] sm:$0xff]  ;;  %v4453_v3 = vcombine.low %v491_v52, %v495_v55 }
  0xf9   : > { %3571 = vmatprep.subr.bf16.mxu1 %v4374_v5  ;;  %v483_v0 = vld [vmem:[%s5247_s9 + $0x708] sm:$0xff]  ;;  %v4318_v4 = vcombine.high %v355_v62, %v359_v63 }
  0xfa   : > { %3531 = vmatpush1.bf16.msra.mxu0 %v4245_v10  ;;  %v487_v1 = vld [vmem:[%s5247_s9 + $0x728] sm:$0xff]  ;;  %v4317_v10 = vcombine.low %v355_v62, %v359_v63 }
  0xfb   : > { %3532 = vmatprep.subr.bf16.mxu0 %v4238_v12  ;;  %v4446_v5 = vcombine.high %v483_v0, %v487_v1  ;;  %v347_v6 = vld [vmem:[%s5247_s9 + $0x2c8] sm:$0xff] }
  0xfc   : > { %3572 = vmatpush1.bf16.msra.mxu1 %v4373_v11  ;;  %v351_v7 = vld [vmem:[%s5247_s9 + $0x2e8] sm:$0xff]  ;;  %v4445_v11 = vcombine.low %v483_v0, %v487_v1 }
  0xfd   : > { %3573 = vmatprep.subr.bf16.mxu1 %v4366_v13  ;;  %v475_v8 = vld [vmem:[%s5247_s9 + $0x6c8] sm:$0xff]  ;;  %v4310_v12 = vcombine.high %v347_v6, %v351_v7 }
  0xfe   : > { %3533 = vmatpush1.bf16.msra.mxu0 %v4237_v21  ;;  %v479_v9 = vld [vmem:[%s5247_s9 + $0x6e8] sm:$0xff]  ;;  %v4309_v21 = vcombine.low %v347_v6, %v351_v7 }
  0xff   : > { %3534 = vmatprep.subr.bf16.mxu0 %v4230_v24  ;;  %v4438_v13 = vcombine.high %v475_v8, %v479_v9  ;;  %v339_v14 = vld [vmem:[%s5247_s9 + $0x288] sm:$0xff] }
 0x100   : > { %3574 = vmatpush1.bf16.msra.mxu1 %v4365_v23  ;;  %v343_v15 = vld [vmem:[%s5247_s9 + $0x2a8] sm:$0xff]  ;;  %v4437_v23 = vcombine.low %v475_v8, %v479_v9 }
 0x101   : > { %3575 = vmatprep.subr.bf16.mxu1 %v4358_v53  ;;  %v467_v17 = vld [vmem:[%s5247_s9 + $0x688] sm:$0xff]  ;;  %v4302_v24 = vcombine.high %v339_v14, %v343_v15 }
 0x102   : > { %3535 = vmatpush1.bf16.msra.mxu0 %v4229_v30  ;;  %v471_v18 = vld [vmem:[%s5247_s9 + $0x6a8] sm:$0xff]  ;;  %v4301_v30 = vcombine.low %v339_v14, %v343_v15 }
 0x103   : > { %3536 = vmatprep.subr.bf16.mxu0 %v4222_v32  ;;  %v4430_v53 = vcombine.high %v467_v17, %v471_v18  ;;  %v331_v25 = vld [vmem:[%s5247_s9 + $0x248] sm:$0xff] }
 0x104   : > { %3576 = vmatpush1.bf16.msra.mxu1 %v4357_v31  ;;  %v335_v26 = vld [vmem:[%s5247_s9 + $0x268] sm:$0xff]  ;;  %v4429_v31 = vcombine.low %v467_v17, %v471_v18 }
 0x105   : > { %3577 = vmatprep.subr.bf16.mxu1 %v4350_v33  ;;  %v459_v54 = vld [vmem:[%s5247_s9 + $0x648] sm:$0xff]  ;;  %v4294_v32 = vcombine.high %v331_v25, %v335_v26 }
 0x106   : > { %3537 = vmatpush1.bf16.msra.mxu0 %v4221_v40  ;;  %v463_v28 = vld [vmem:[%s5247_s9 + $0x668] sm:$0xff]  ;;  %v4293_v40 = vcombine.low %v331_v25, %v335_v26 }
 0x107   : > { %3538 = vmatprep.subr.bf16.mxu0 %v4342_v42  ;;  %v4422_v33 = vcombine.high %v459_v54, %v463_v28  ;;  %v323_v34 = vld [vmem:[%s5247_s9 + $0x208] sm:$0xff] }
 0x108   : > { %3578 = vmatpush1.bf16.msra.mxu1 %v4349_v41  ;;  %v327_v35 = vld [vmem:[%s5247_s9 + $0x228] sm:$0xff]  ;;  %v4421_v41 = vcombine.low %v459_v54, %v463_v28 }
 0x109   : > { %3579 = vmatprep.subr.bf16.mxu1 %v4470_v43  ;;  %v451_v37 = vld [vmem:[%s5247_s9 + $0x608] sm:$0xff]  ;;  %v4286_v42 = vcombine.high %v323_v34, %v327_v35 }
 0x10a   : > { %3539 = vmatpush2.bf16.msra.mxu0 %v4341_v22  ;;  %v455_v38 = vld [vmem:[%s5247_s9 + $0x628] sm:$0xff]  ;;  %v4285_v22 = vcombine.low %v323_v34, %v327_v35 }
 0x10b   : > { %3540 = vmatprep.subr.bf16.mxu0 %v4334_v48  ;;  %v4414_v43 = vcombine.high %v451_v37, %v455_v38  ;;  %v571_v44 = vld [vmem:[%s5247_s9 + $0x9c8] sm:$0xff] }
 0x10c   : > { %3580 = vmatpush2.bf16.msra.mxu1 %v4469_v47  ;;  %v575_v19 = vld [vmem:[%s5247_s9 + $0x9e8] sm:$0xff]  ;;  %v4413_v47 = vcombine.low %v451_v37, %v455_v38 }
 0x10d   : > { %3581 = vmatprep.subr.bf16.mxu1 %v4462_v49  ;;  %v699_v45 = vld [vmem:[%s5247_s9 + $0xdc8] sm:$0xff]  ;;  %v4534_v48 = vcombine.high %v571_v44, %v575_v19 }
 0x10e   : > { %3541 = vmatpush2.bf16.msra.mxu0 %v4333_v56  ;;  %v703_v46 = vld [vmem:[%s5247_s9 + $0xde8] sm:$0xff]  ;;  %v4533_v56 = vcombine.low %v571_v44, %v575_v19 }
 0x10f   : > { %3542 = vmatprep.subr.bf16.mxu0 %v4326_v60  ;;  %v4662_v49 = vcombine.high %v699_v45, %v703_v46  ;;  %v563_v50 = vld [vmem:[%s5247_s9 + $0x988] sm:$0xff] }
 0x110   : > { %3582 = vmatpush2.bf16.msra.mxu1 %v4461_v57  ;;  %v567_v51 = vld [vmem:[%s5247_s9 + $0x9a8] sm:$0xff]  ;;  %v4661_v57 = vcombine.low %v699_v45, %v703_v46 }
 0x111   : > { %3583 = vmatprep.subr.bf16.mxu1 %v4454_v61  ;;  %v691_v52 = vld [vmem:[%s5247_s9 + $0xd88] sm:$0xff]  ;;  %v4526_v60 = vcombine.high %v563_v50, %v567_v51 }
 0x112   : > { %3543 = vmatpush2.bf16.msra.mxu0 %v4325_v2  ;;  %v695_v55 = vld [vmem:[%s5247_s9 + $0xda8] sm:$0xff]  ;;  %v4525_v2 = vcombine.low %v563_v50, %v567_v51 }
 0x113   : > { %3544 = vmatprep.subr.bf16.mxu0 %v4318_v4  ;;  %v4654_v61 = vcombine.high %v691_v52, %v695_v55  ;;  %v555_v62 = vld [vmem:[%s5247_s9 + $0x948] sm:$0xff] }
 0x114   : > { %3584 = vmatpush2.bf16.msra.mxu1 %v4453_v3  ;;  %v559_v63 = vld [vmem:[%s5247_s9 + $0x968] sm:$0xff]  ;;  %v4653_v3 = vcombine.low %v691_v52, %v695_v55 }
 0x115   : > { %3585 = vmatprep.subr.bf16.mxu1 %v4446_v5  ;;  %v683_v0 = vld [vmem:[%s5247_s9 + $0xd48] sm:$0xff]  ;;  %v4518_v4 = vcombine.high %v555_v62, %v559_v63 }
 0x116   : > { %3545 = vmatpush2.bf16.msra.mxu0 %v4317_v10  ;;  %v687_v1 = vld [vmem:[%s5247_s9 + $0xd68] sm:$0xff]  ;;  %v4517_v10 = vcombine.low %v555_v62, %v559_v63 }
 0x117   : > { %3546 = vmatprep.subr.bf16.mxu0 %v4310_v12  ;;  %v4646_v5 = vcombine.high %v683_v0, %v687_v1  ;;  %v547_v6 = vld [vmem:[%s5247_s9 + $0x908] sm:$0xff] }
 0x118   : > { %3586 = vmatpush2.bf16.msra.mxu1 %v4445_v11  ;;  %v551_v7 = vld [vmem:[%s5247_s9 + $0x928] sm:$0xff]  ;;  %v4645_v11 = vcombine.low %v683_v0, %v687_v1 }
 0x119   : > { %3587 = vmatprep.subr.bf16.mxu1 %v4438_v13  ;;  %v675_v8 = vld [vmem:[%s5247_s9 + $0xd08] sm:$0xff]  ;;  %v4510_v12 = vcombine.high %v547_v6, %v551_v7 }
 0x11a   : > { %3547 = vmatpush2.bf16.msra.mxu0 %v4309_v21  ;;  %v679_v9 = vld [vmem:[%s5247_s9 + $0xd28] sm:$0xff]  ;;  %v4509_v21 = vcombine.low %v547_v6, %v551_v7 }
 0x11b   : > { %3548 = vmatprep.subr.bf16.mxu0 %v4302_v24  ;;  %v4638_v13 = vcombine.high %v675_v8, %v679_v9  ;;  %v539_v14 = vld [vmem:[%s5247_s9 + $0x8c8] sm:$0xff] }
 0x11c   : > { %3588 = vmatpush2.bf16.msra.mxu1 %v4437_v23  ;;  %v543_v15 = vld [vmem:[%s5247_s9 + $0x8e8] sm:$0xff]  ;;  %v4637_v23 = vcombine.low %v675_v8, %v679_v9 }
 0x11d   : > { %3589 = vmatprep.subr.bf16.mxu1 %v4430_v53  ;;  %v667_v17 = vld [vmem:[%s5247_s9 + $0xcc8] sm:$0xff]  ;;  %v4502_v24 = vcombine.high %v539_v14, %v543_v15 }
 0x11e   : > { %3549 = vmatpush2.bf16.msra.mxu0 %v4301_v30  ;;  %v671_v18 = vld [vmem:[%s5247_s9 + $0xce8] sm:$0xff]  ;;  %v4501_v30 = vcombine.low %v539_v14, %v543_v15 }
 0x11f   : > { %3550 = vmatprep.subr.bf16.mxu0 %v4294_v32  ;;  %v4630_v53 = vcombine.high %v667_v17, %v671_v18  ;;  %v531_v25 = vld [vmem:[%s5247_s9 + $0x888] sm:$0xff] }
 0x120   : > { %3590 = vmatpush2.bf16.msra.mxu1 %v4429_v31  ;;  %v535_v26 = vld [vmem:[%s5247_s9 + $0x8a8] sm:$0xff]  ;;  %v4629_v31 = vcombine.low %v667_v17, %v671_v18 }
 0x121   : > { %3591 = vmatprep.subr.bf16.mxu1 %v4422_v33  ;;  %v659_v54 = vld [vmem:[%s5247_s9 + $0xc88] sm:$0xff]  ;;  %v4494_v32 = vcombine.high %v531_v25, %v535_v26 }
 0x122   : > { %3551 = vmatpush2.bf16.msra.mxu0 %v4293_v40  ;;  %v663_v28 = vld [vmem:[%s5247_s9 + $0xca8] sm:$0xff]  ;;  %v4493_v40 = vcombine.low %v531_v25, %v535_v26 }
 0x123   : > { %3552 = vmatprep.subr.bf16.mxu0 %v4286_v42  ;;  %v4622_v33 = vcombine.high %v659_v54, %v663_v28  ;;  %v523_v34 = vld [vmem:[%s5247_s9 + $0x848] sm:$0xff] }
 0x124   : > { %3592 = vmatpush2.bf16.msra.mxu1 %v4421_v41  ;;  %v527_v35 = vld [vmem:[%s5247_s9 + $0x868] sm:$0xff]  ;;  %v4621_v41 = vcombine.low %v659_v54, %v663_v28 }
 0x125   : > { %3593 = vmatprep.subr.bf16.mxu1 %v4414_v43  ;;  %v651_v37 = vld [vmem:[%s5247_s9 + $0xc48] sm:$0xff]  ;;  %v4486_v42 = vcombine.high %v523_v34, %v527_v35 }
 0x126   : > { %3553 = vmatpush2.bf16.msra.mxu0 %v4285_v22  ;;  %v655_v38 = vld [vmem:[%s5247_s9 + $0xc68] sm:$0xff]  ;;  %v4485_v22 = vcombine.low %v523_v34, %v527_v35 }
 0x127   : > { %3604 = vmatprep.subr.bf16.mxu0 %v4534_v48  ;;  %v4614_v43 = vcombine.high %v651_v37, %v655_v38  ;;  %v515_v44 = vld [vmem:[%s5247_s9 + $0x808] sm:$0xff] }
 0x128   : > { %3594 = vmatpush2.bf16.msra.mxu1 %v4413_v47  ;;  %v519_v19 = vld [vmem:[%s5247_s9 + $0x828] sm:$0xff]  ;;  %v4613_v47 = vcombine.low %v651_v37, %v655_v38 }
 0x129   : > { %3645 = vmatprep.subr.bf16.mxu1 %v4662_v49  ;;  %3555 = vmatmul.mubr.bf16.vlgmr.msra.gmra.mxu0 %v5341_v16  ;;  %v643_v45 = vld [vmem:[%s5247_s9 + $0xc08] sm:$0xff]  ;;  %v4478_v48 = vcombine.high %v515_v44, %v519_v19 }
 0x12a   : > { %3605 = vmatpush1.bf16.msra.mxu0 %v4533_v56  ;;  %3636 = vmatprep.mubr.bf16.mxu0 %v5359_v27  ;;  %v647_v46 = vld [vmem:[%s5247_s9 + $0xc28] sm:$0xff]  ;;  %v4477_v56 = vcombine.low %v515_v44, %v519_v19 }
 0x12b   : > { %3596 = vmatmul.mubr.bf16.vlgmr.msra.gmra.mxu1 %v5350_v20  ;;  %3606 = vmatprep.subr.bf16.mxu0 %v4526_v60  ;;  %v4606_v49 = vcombine.high %v643_v45, %v647_v46  ;;  %v635_v50 = vld [vmem:[%s5247_s9 + $0xbc8] sm:$0xff] }
 0x12c   : > { %3646 = vmatpush1.bf16.msra.mxu1 %v4661_v57  ;;  %3677 = vmatprep.mubr.bf16.mxu1 %v5366_v29  ;;  %v639_v51 = vld [vmem:[%s5247_s9 + $0xbe8] sm:$0xff]  ;;  %v4605_v57 = vcombine.low %v643_v45, %v647_v46 }
 0x12d   : > { %3647 = vmatprep.subr.bf16.mxu1 %v4654_v61  ;;  %v763_v52 = vld [vmem:[%s5247_s9 + $0xfc8] sm:$0xff]  ;;  %v4598_v60 = vcombine.high %v635_v50, %v639_v51 }
 0x12e   : > { %3607 = vmatpush1.bf16.msra.mxu0 %v4525_v2  ;;  %v767_v55 = vld [vmem:[%s5247_s9 + $0xfe8] sm:$0xff]  ;;  %v4597_v2 = vcombine.low %v635_v50, %v639_v51 }
 0x12f   : > { %3608 = vmatprep.subr.bf16.mxu0 %v4518_v4  ;;  %v4726_v61 = vcombine.high %v763_v52, %v767_v55  ;;  %v627_v62 = vld [vmem:[%s5247_s9 + $0xb88] sm:$0xff] }
 0x130   : > { %3648 = vmatpush1.bf16.msra.mxu1 %v4653_v3  ;;  %v631_v63 = vld [vmem:[%s5247_s9 + $0xba8] sm:$0xff]  ;;  %v4725_v3 = vcombine.low %v763_v52, %v767_v55 }
 0x131   : > { %3649 = vmatprep.subr.bf16.mxu1 %v4646_v5  ;;  %v755_v0 = vld [vmem:[%s5247_s9 + $0xf88] sm:$0xff]  ;;  %v4590_v4 = vcombine.high %v627_v62, %v631_v63 }
 0x132   : > { %3609 = vmatpush1.bf16.msra.mxu0 %v4517_v10  ;;  %v759_v1 = vld [vmem:[%s5247_s9 + $0xfa8] sm:$0xff]  ;;  %v4589_v10 = vcombine.low %v627_v62, %v631_v63  ;;  %v316_v62 = vld [vmem:[%s5247_s9 + $0x1d0] sm:$0xff] }
 0x133   : > { %3610 = vmatprep.subr.bf16.mxu0 %v4510_v12  ;;  %v4718_v5 = vcombine.high %v755_v0, %v759_v1  ;;  %v619_v6 = vld [vmem:[%s5247_s9 + $0xb48] sm:$0xff]  ;;  %v320_v63 = vld [vmem:[%s5247_s9 + $0x1f0] sm:$0xff] }
 0x134   : > { %3650 = vmatpush1.bf16.msra.mxu1 %v4645_v11  ;;  %v623_v7 = vld [vmem:[%s5247_s9 + $0xb68] sm:$0xff]  ;;  %v4717_v11 = vcombine.low %v755_v0, %v759_v1  ;;  %v444_v0 = vld [vmem:[%s5247_s9 + $0x5d0] sm:$0xff] }
 0x135   : > { %3651 = vmatprep.subr.bf16.mxu1 %v4638_v13  ;;  %v747_v8 = vld [vmem:[%s5247_s9 + $0xf48] sm:$0xff]  ;;  %v4582_v12 = vcombine.high %v619_v6, %v623_v7  ;;  %v448_v1 = vld [vmem:[%s5247_s9 + $0x5f0] sm:$0xff] }
 0x136   : > { %3611 = vmatpush1.bf16.msra.mxu0 %v4509_v21  ;;  %v751_v9 = vld [vmem:[%s5247_s9 + $0xf68] sm:$0xff]  ;;  %v4581_v21 = vcombine.low %v619_v6, %v623_v7  ;;  %v308_v6 = vld [vmem:[%s5247_s9 + $0x190] sm:$0xff] }
 0x137   : > { %3612 = vmatprep.subr.bf16.mxu0 %v4502_v24  ;;  %v4710_v13 = vcombine.high %v747_v8, %v751_v9  ;;  %v611_v14 = vld [vmem:[%s5247_s9 + $0xb08] sm:$0xff]  ;;  %v312_v7 = vld [vmem:[%s5247_s9 + $0x1b0] sm:$0xff] }
 0x138   : > { %3652 = vmatpush1.bf16.msra.mxu1 %v4637_v23  ;;  %v615_v15 = vld [vmem:[%s5247_s9 + $0xb28] sm:$0xff]  ;;  %v4709_v23 = vcombine.low %v747_v8, %v751_v9  ;;  %v436_v8 = vld [vmem:[%s5247_s9 + $0x590] sm:$0xff] }
 0x139   : > { %3653 = vmatprep.subr.bf16.mxu1 %v4630_v53  ;;  %v739_v17 = vld [vmem:[%s5247_s9 + $0xf08] sm:$0xff]  ;;  %v4574_v24 = vcombine.high %v611_v14, %v615_v15  ;;  %v440_v9 = vld [vmem:[%s5247_s9 + $0x5b0] sm:$0xff] }
 0x13a   : > { %3613 = vmatpush1.bf16.msra.mxu0 %v4501_v30  ;;  %v743_v18 = vld [vmem:[%s5247_s9 + $0xf28] sm:$0xff]  ;;  %v4573_v30 = vcombine.low %v611_v14, %v615_v15  ;;  %v300_v14 = vld [vmem:[%s5247_s9 + $0x150] sm:$0xff] }
 0x13b   : > { %3614 = vmatprep.subr.bf16.mxu0 %v4494_v32  ;;  %v4702_v53 = vcombine.high %v739_v17, %v743_v18  ;;  %v603_v25 = vld [vmem:[%s5247_s9 + $0xac8] sm:$0xff]  ;;  %v304_v15 = vld [vmem:[%s5247_s9 + $0x170] sm:$0xff] }
 0x13c   : > { %3654 = vmatpush1.bf16.msra.mxu1 %v4629_v31  ;;  %v607_v26 = vld [vmem:[%s5247_s9 + $0xae8] sm:$0xff]  ;;  %v4701_v31 = vcombine.low %v739_v17, %v743_v18  ;;  %v428_v18 = vld [vmem:[%s5247_s9 + $0x550] sm:$0xff] }
 0x13d   : > { %3655 = vmatprep.subr.bf16.mxu1 %v4622_v33  ;;  %v731_v54 = vld [vmem:[%s5247_s9 + $0xec8] sm:$0xff]  ;;  %v4566_v32 = vcombine.high %v603_v25, %v607_v26 }
 0x13e   : > { %3615 = vmatpush1.bf16.msra.mxu0 %v4493_v40  ;;  %v735_v28 = vld [vmem:[%s5247_s9 + $0xee8] sm:$0xff]  ;;  %v4565_v40 = vcombine.low %v603_v25, %v607_v26  ;;  %v4399_v25 = vcombine.low %v436_v8, %v440_v9  ;;  %v4264_v26 = vcombine.high %v300_v14, %v304_v15 }
 0x13f   : > { %3616 = vmatprep.subr.bf16.mxu0 %v4486_v42  ;;  %v4694_v33 = vcombine.high %v731_v54, %v735_v28  ;;  %v595_v34 = vld [vmem:[%s5247_s9 + $0xa88] sm:$0xff] }
 0x140   : > { %3656 = vmatpush1.bf16.msra.mxu1 %v4621_v41  ;;  %v599_v35 = vld [vmem:[%s5247_s9 + $0xaa8] sm:$0xff]  ;;  %v4693_v41 = vcombine.low %v731_v54, %v735_v28 }
 0x141   : > { %3657 = vmatprep.subr.bf16.mxu1 %v4614_v43  ;;  %v723_v37 = vld [vmem:[%s5247_s9 + $0xe88] sm:$0xff]  ;;  %v4558_v42 = vcombine.high %v595_v34, %v599_v35 }
 0x142   : > { %3617 = vmatpush1.bf16.msra.mxu0 %v4485_v22  ;;  %v727_v38 = vld [vmem:[%s5247_s9 + $0xea8] sm:$0xff]  ;;  %v4557_v22 = vcombine.low %v595_v34, %v599_v35  ;;  %v424_v34 = vld [vmem:[%s5247_s9 + $0x530] sm:$0xff] }
 0x143   : > { %3618 = vmatprep.subr.bf16.mxu0 %v4478_v48  ;;  %v4686_v43 = vcombine.high %v723_v37, %v727_v38  ;;  %v587_v44 = vld [vmem:[%s5247_s9 + $0xa48] sm:$0xff] }
 0x144   : > { %3658 = vmatpush1.bf16.msra.mxu1 %v4613_v47  ;;  %v591_v19 = vld [vmem:[%s5247_s9 + $0xa68] sm:$0xff]  ;;  %v4685_v47 = vcombine.low %v723_v37, %v727_v38  ;;  %v4263_v37 = vcombine.low %v300_v14, %v304_v15  ;;  %v380_v14 = vld [vmem:[%s5247_s9 + $0x3d0] sm:$0xff] }
 0x145   : > { %3659 = vmatprep.subr.bf16.mxu1 %v4606_v49  ;;  %v715_v45 = vld [vmem:[%s5247_s9 + $0xe48] sm:$0xff]  ;;  %v4550_v48 = vcombine.high %v587_v44, %v591_v19  ;;  %v384_v15 = vld [vmem:[%s5247_s9 + $0x3f0] sm:$0xff] }
 0x146   : > { %3619 = vmatpush1.bf16.msra.mxu0 %v4477_v56  ;;  %v719_v46 = vld [vmem:[%s5247_s9 + $0xe68] sm:$0xff]  ;;  %v4549_v56 = vcombine.low %v587_v44, %v591_v19  ;;  %v284_v44 = vld [vmem:[%s5247_s9 + $0xd0] sm:$0xff] }
 0x147   : > { %3620 = vmatprep.subr.bf16.mxu0 %v4598_v60  ;;  %v4678_v49 = vcombine.high %v715_v45, %v719_v46  ;;  %v579_v50 = vld [vmem:[%s5247_s9 + $0xa08] sm:$0xff]  ;;  %v288_v19 = vld [vmem:[%s5247_s9 + $0xf0] sm:$0xff] }
 0x148   : > { %3660 = vmatpush1.bf16.msra.mxu1 %v4605_v57  ;;  %v583_v51 = vld [vmem:[%s5247_s9 + $0xa28] sm:$0xff]  ;;  %v4677_v57 = vcombine.low %v715_v45, %v719_v46  ;;  %v412_v45 = vld [vmem:[%s5247_s9 + $0x4d0] sm:$0xff] }
 0x149   : > { %3661 = vmatprep.subr.bf16.mxu1 %v4726_v61  ;;  %v707_v52 = vld [vmem:[%s5247_s9 + $0xe08] sm:$0xff]  ;;  %v4542_v60 = vcombine.high %v579_v50, %v583_v51  ;;  %v416_v46 = vld [vmem:[%s5247_s9 + $0x4f0] sm:$0xff] }
 0x14a   : > { %3621 = vmatpush2.bf16.msra.mxu0 %v4597_v2  ;;  %v711_v55 = vld [vmem:[%s5247_s9 + $0xe28] sm:$0xff]  ;;  %v4541_v2 = vcombine.low %v579_v50, %v583_v51  ;;  %v276_v50 = vld [vmem:[%s5247_s9 + $0x90] sm:$0xff] }
 0x14b   : > { %3622 = vmatprep.subr.bf16.mxu0 %v4590_v4  ;;  %v4670_v61 = vcombine.high %v707_v52, %v711_v55  ;;  %v4280_v4 = vcombine.high %v316_v62, %v320_v63  ;;  %v280_v51 = vld [vmem:[%s5247_s9 + $0xb0] sm:$0xff] }
 0x14c   : > { %3662 = vmatpush2.bf16.msra.mxu1 %v4725_v3  ;;  %v4669_v3 = vcombine.low %v707_v52, %v711_v55  ;;  %v404_v52 = vld [vmem:[%s5247_s9 + $0x490] sm:$0xff] }
 0x14d   : > { %3663 = vmatprep.subr.bf16.mxu1 %v4718_v5  ;;  %v4408_v5 = vcombine.high %v444_v0, %v448_v1  ;;  %v408_v55 = vld [vmem:[%s5247_s9 + $0x4b0] sm:$0xff] }
 0x14e   : > { %3623 = vmatpush2.bf16.msra.mxu0 %v4589_v10  ;;  %v4279_v10 = vcombine.low %v316_v62, %v320_v63  ;;  %v268_v62 = vld [vmem:[%s5247_s9 + $0x50] sm:$0xff] }
 0x14f   : > { %3624 = vmatprep.subr.bf16.mxu0 %v4582_v12  ;;  %v4272_v12 = vcombine.high %v308_v6, %v312_v7  ;;  %v272_v63 = vld [vmem:[%s5247_s9 + $0x70] sm:$0xff] }
 0x150   : > { %3664 = vmatpush2.bf16.msra.mxu1 %v4717_v11  ;;  %v4407_v11 = vcombine.low %v444_v0, %v448_v1  ;;  %v396_v0 = vld [vmem:[%s5247_s9 + $0x450] sm:$0xff] }
 0x151   : > { %3665 = vmatprep.subr.bf16.mxu1 %v4710_v13  ;;  %v4400_v13 = vcombine.high %v436_v8, %v440_v9  ;;  %v400_v1 = vld [vmem:[%s5247_s9 + $0x470] sm:$0xff] }
 0x152   : > { %3625 = vmatpush2.bf16.msra.mxu0 %v4581_v21  ;;  %v432_v21 = vld [vmem:[%s5247_s9 + $0x570] sm:$0xff] }
 0x153   : > { %3626 = vmatprep.subr.bf16.mxu0 %v4574_v24  ;;  %v4271_v24 = vcombine.low %v308_v6, %v312_v7  ;;  %v4392_v28 = vcombine.high %v428_v18, %v432_v21  ;;  %v260_v6 = vld [vmem:[%s5247_s9 + $0x10] sm:$0xff] }
 0x154   : > { %3666 = vmatpush2.bf16.msra.mxu1 %v4709_v23  ;;  %v264_v7 = vld [vmem:[%s5247_s9 + $0x30] sm:$0xff] }
 0x155   : > { %3667 = vmatprep.subr.bf16.mxu1 %v4702_v53  ;;  %v388_v8 = vld [vmem:[%s5247_s9 + $0x410] sm:$0xff] }
 0x156   : > { %3627 = vmatpush2.bf16.msra.mxu0 %v4573_v30  ;;  %v292_v30 = vld [vmem:[%s5247_s9 + $0x110] sm:$0xff] }
 0x157   : > { %3628 = vmatprep.subr.bf16.mxu0 %v4566_v32  ;;  %v392_v9 = vld [vmem:[%s5247_s9 + $0x430] sm:$0xff] }
 0x158   : > { %3668 = vmatpush2.bf16.msra.mxu1 %v4701_v31  ;;  %v296_v31 = vld [vmem:[%s5247_s9 + $0x130] sm:$0xff] }
 0x159   : > { %3669 = vmatprep.subr.bf16.mxu1 %v4694_v33  ;;  %v420_v33 = vld [vmem:[%s5247_s9 + $0x510] sm:$0xff] }
 0x15a   : > { %3629 = vmatpush2.bf16.msra.mxu0 %v4565_v40  ;;  %v4391_v40 = vcombine.low %v428_v18, %v432_v21  ;;  %v508_v18 = vld [vmem:[%s5247_s9 + $0x7d0] sm:$0xff] }
 0x15b   : > { %3630 = vmatprep.subr.bf16.mxu0 %v4558_v42  ;;  %v512_v21 = vld [vmem:[%s5247_s9 + $0x7f0] sm:$0xff] }
 0x15c   : > { %3670 = vmatpush2.bf16.msra.mxu1 %v4693_v41  ;;  %v4256_v41 = vcombine.high %v292_v30, %v296_v31 }
 0x15d   : > { %3671 = vmatprep.subr.bf16.mxu1 %v4686_v43  ;;  %v4384_v43 = vcombine.high %v420_v33, %v424_v34 }
 0x15e   : > { %3631 = vmatpush2.bf16.msra.mxu0 %v4557_v22  ;;  %v4255_v22 = vcombine.low %v292_v30, %v296_v31  ;;  %v372_v30 = vld [vmem:[%s5247_s9 + $0x390] sm:$0xff] }
 0x15f   : > { %3632 = vmatprep.subr.bf16.mxu0 %v4550_v48  ;;  %v4248_v48 = vcombine.high %v284_v44, %v288_v19  ;;  %v376_v31 = vld [vmem:[%s5247_s9 + $0x3b0] sm:$0xff] }
 0x160   : > { %3672 = vmatpush2.bf16.msra.mxu1 %v4685_v47  ;;  %v4383_v47 = vcombine.low %v420_v33, %v424_v34  ;;  %v504_v33 = vld [vmem:[%s5247_s9 + $0x7b0] sm:$0xff]  ;;  %v4343_v34 = vcombine.low %v380_v14, %v384_v15 }
 0x161   : > { %3673 = vmatprep.subr.bf16.mxu1 %v4678_v49  ;;  %v4376_v49 = vcombine.high %v412_v45, %v416_v46 }
 0x162   : > { %3633 = vmatpush2.bf16.msra.mxu0 %v4549_v56  ;;  %v4247_v56 = vcombine.low %v284_v44, %v288_v19  ;;  %v4335_v44 = vcombine.low %v372_v30, %v376_v31 }
 0x163   : > { %3634 = vmatprep.subr.bf16.mxu0 %v4542_v60  ;;  %v4240_v60 = vcombine.high %v276_v50, %v280_v51 }
 0x164   : > { %3674 = vmatpush2.bf16.msra.mxu1 %v4677_v57  ;;  %v4375_v57 = vcombine.low %v412_v45, %v416_v46 }
 0x165   : > { %3675 = vmatprep.subr.bf16.mxu1 %v4670_v61  ;;  %v4368_v61 = vcombine.high %v404_v52, %v408_v55 }
 0x166   : > { %3635 = vmatpush2.bf16.msra.mxu0 %v4541_v2  ;;  %v4239_v2 = vcombine.low %v276_v50, %v280_v51 }
 0x167   : > { %3686 = vmatprep.subr.bf16.mxu0 %v4280_v4  ;;  %v4232_v4 = vcombine.high %v268_v62, %v272_v63 }
 0x168   : > { %3676 = vmatpush2.bf16.msra.mxu1 %v4669_v3  ;;  %v4367_v3 = vcombine.low %v404_v52, %v408_v55 }
 0x169   : > { %3727 = vmatprep.subr.bf16.mxu1 %v4408_v5  ;;  %v5577_v17 = vpop.f32.mrf.mxu0  ;;  %3637 = vmatmul.mubr.bf16.vlgmr.msra.gmra.mxu0 %v5431_v36  ;;  %v4360_v5 = vcombine.high %v396_v0, %v400_v1 }
 0x16a   : > { %3687 = vmatpush1.bf16.msra.mxu0 %v4279_v10  ;;  %3718 = vmatprep.mubr.bf16.mxu0 %v5291_v58  ;;  %v4231_v10 = vcombine.low %v268_v62, %v272_v63 }
 0x16b   : > { %v5582_v23 = vpop.f32.mrf.mxu1  ;;  %3678 = vmatmul.mubr.bf16.vlgmr.msra.gmra.mxu1 %v5437_v39  ;;  %v5585_v53 = vpop.f32.mrf.mxu0  ;;  %3688 = vmatprep.subr.bf16.mxu0 %v4272_v12  ;;  %v4224_v12 = vcombine.high %v260_v6, %v264_v7 }
 0x16c   : > { %3728 = vmatpush1.bf16.msra.mxu1 %v4407_v11  ;;  %3759 = vmatprep.mubr.bf16.mxu1 %v5295_v59  ;;  %v4359_v11 = vcombine.low %v396_v0, %v400_v1 }
 0x16d   : > { %v5587_v54 = vpop.f32.mrf.mxu1  ;;  %3729 = vmatprep.subr.bf16.mxu1 %v4400_v13  ;;  %v3396_v32 = vpop.f32.mrf.mxu0  ;;  %v4352_v13 = vcombine.high %v388_v8, %v392_v9 }
 0x16e   : > { %3689 = vmatpush1.bf16.msra.mxu0 %v4271_v24  ;;  %v4223_v24 = vcombine.low %v260_v6, %v264_v7  ;;  %v500_v32 = vld [vmem:[%s5247_s9 + $0x790] sm:$0xff] }
 0x16f   : > { %v3437_v35 = vpop.f32.mrf.mxu1  ;;  %v3397_v38 = vpop.f32.mrf.mxu0  ;;  %3690 = vmatprep.subr.bf16.mxu0 %v4264_v26  ;;  %v4344_v26 = vcombine.high %v380_v14, %v384_v15  ;;  %v4463_v19 = vcombine.low %v500_v32, %v504_v33 }
 0x170   : > { %3730 = vmatpush1.bf16.msra.mxu1 %v4399_v25  ;;  %v4351_v25 = vcombine.low %v388_v8, %v392_v9  ;;  %v4471_v35 = vcombine.low %v508_v18, %v512_v21  ;;  %v4464_v38 = vcombine.high %v500_v32, %v504_v33 }
 0x171   : > { %v3438_v42 = vpop.f32.mrf.mxu1  ;;  %3731 = vmatprep.subr.bf16.mxu1 %v4392_v28  ;;  %v4472_v28 = vcombine.high %v508_v18, %v512_v21 }
 0x172   : > { %3691 = vmatpush1.bf16.msra.mxu0 %v4263_v37  ;;  %v4336_v37 = vcombine.high %v372_v30, %v376_v31  ;;  %v492_v42 = vld [vmem:[%s5247_s9 + $0x750] sm:$0xff] }
 0x173   : > { %3692 = vmatprep.subr.bf16.mxu0 %v4256_v41  ;;  %v368_v41 = vld [vmem:[%s5247_s9 + $0x370] sm:$0xff] }
 0x174   : > { %3732 = vmatpush1.bf16.msra.mxu1 %v4391_v40  ;;  %v364_v40 = vld [vmem:[%s5247_s9 + $0x350] sm:$0xff] }
 0x175   : > { %3733 = vmatprep.subr.bf16.mxu1 %v4384_v43  ;;  %v496_v43 = vld [vmem:[%s5247_s9 + $0x770] sm:$0xff]  ;;  %v4328_v45 = vcombine.high %v364_v40, %v368_v41  ;;  %v4327_v50 = vcombine.low %v364_v40, %v368_v41 }
 0x176   : > { %3693 = vmatpush1.bf16.msra.mxu0 %v4255_v22  ;;  %v4456_v46 = vcombine.high %v492_v42, %v496_v43  ;;  %v356_v22 = vld [vmem:[%s5247_s9 + $0x310] sm:$0xff]  ;;  %v4455_v51 = vcombine.low %v492_v42, %v496_v43 }
 0x177   : > { %3694 = vmatprep.subr.bf16.mxu0 %v4248_v48  ;;  %v484_v48 = vld [vmem:[%s5247_s9 + $0x710] sm:$0xff] }
 0x178   : > { %3734 = vmatpush1.bf16.msra.mxu1 %v4383_v47  ;;  %v360_v47 = vld [vmem:[%s5247_s9 + $0x330] sm:$0xff] }
 0x179   : > { %3735 = vmatprep.subr.bf16.mxu1 %v4376_v49  ;;  %v488_v49 = vld [vmem:[%s5247_s9 + $0x730] sm:$0xff]  ;;  %v4320_v52 = vcombine.high %v356_v22, %v360_v47  ;;  %v4319_v62 = vcombine.low %v356_v22, %v360_v47 }
 0x17a   : > { %3695 = vmatpush1.bf16.msra.mxu0 %v4247_v56  ;;  %v4448_v55 = vcombine.high %v484_v48, %v488_v49  ;;  %v348_v56 = vld [vmem:[%s5247_s9 + $0x2d0] sm:$0xff]  ;;  %v4447_v63 = vcombine.low %v484_v48, %v488_v49  ;;  %v3434_v49 = vadd.f32 %v5582_v23, %v5577_v17 }
 0x17b   : > { %3696 = vmatprep.subr.bf16.mxu0 %v4240_v60  ;;  %v476_v60 = vld [vmem:[%s5247_s9 + $0x6d0] sm:$0xff] }
 0x17c   : > { %3736 = vmatpush1.bf16.msra.mxu1 %v4375_v57  ;;  %v352_v57 = vld [vmem:[%s5247_s9 + $0x2f0] sm:$0xff] }
 0x17d   : > { %3737 = vmatprep.subr.bf16.mxu1 %v4368_v61  ;;  %v480_v61 = vld [vmem:[%s5247_s9 + $0x6f0] sm:$0xff]  ;;  %v4312_v0 = vcombine.high %v348_v56, %v352_v57  ;;  %v4311_v6 = vcombine.low %v348_v56, %v352_v57 }
 0x17e   : > { %3697 = vmatpush1.bf16.msra.mxu0 %v4239_v2  ;;  %v4440_v1 = vcombine.high %v476_v60, %v480_v61  ;;  %v340_v2 = vld [vmem:[%s5247_s9 + $0x290] sm:$0xff]  ;;  %v4439_v7 = vcombine.low %v476_v60, %v480_v61  ;;  %v3436_v60 = vadd.f32 %v5587_v54, %v5585_v53 }
 0x17f   : > { %3698 = vmatprep.subr.bf16.mxu0 %v4232_v4  ;;  %v468_v4 = vld [vmem:[%s5247_s9 + $0x690] sm:$0xff] }
 0x180   : > { %3738 = vmatpush1.bf16.msra.mxu1 %v4367_v3  ;;  %v344_v3 = vld [vmem:[%s5247_s9 + $0x2b0] sm:$0xff] }
 0x181   : > { %3739 = vmatprep.subr.bf16.mxu1 %v4360_v5  ;;  %v472_v5 = vld [vmem:[%s5247_s9 + $0x6b0] sm:$0xff]  ;;  %v4304_v8 = vcombine.high %v340_v2, %v344_v3  ;;  %v4303_v14 = vcombine.low %v340_v2, %v344_v3 }
 0x182   : > { %3699 = vmatpush1.bf16.msra.mxu0 %v4231_v10  ;;  %v4432_v9 = vcombine.high %v468_v4, %v472_v5  ;;  %v332_v10 = vld [vmem:[%s5247_s9 + $0x250] sm:$0xff]  ;;  %v4431_v15 = vcombine.low %v468_v4, %v472_v5 }
 0x183   : > { %3700 = vmatprep.subr.bf16.mxu0 %v4224_v12  ;;  %v460_v12 = vld [vmem:[%s5247_s9 + $0x650] sm:$0xff] }
 0x184   : > { %3740 = vmatpush1.bf16.msra.mxu1 %v4359_v11  ;;  %v336_v11 = vld [vmem:[%s5247_s9 + $0x270] sm:$0xff] }
 0x185   : > { %3741 = vmatprep.subr.bf16.mxu1 %v4352_v13  ;;  %v464_v13 = vld [vmem:[%s5247_s9 + $0x670] sm:$0xff]  ;;  %v4296_v18 = vcombine.high %v332_v10, %v336_v11  ;;  %v4295_v30 = vcombine.low %v332_v10, %v336_v11 }
 0x186   : > { %3701 = vmatpush1.bf16.msra.mxu0 %v4223_v24  ;;  %v4424_v21 = vcombine.high %v460_v12, %v464_v13  ;;  %v324_v24 = vld [vmem:[%s5247_s9 + $0x210] sm:$0xff]  ;;  %v4423_v31 = vcombine.low %v460_v12, %v464_v13 }
 0x187   : > { %3702 = vmatprep.subr.bf16.mxu0 %v4344_v26  ;;  %v452_v26 = vld [vmem:[%s5247_s9 + $0x610] sm:$0xff] }
 0x188   : > { %3742 = vmatpush1.bf16.msra.mxu1 %v4351_v25  ;;  %v328_v25 = vld [vmem:[%s5247_s9 + $0x230] sm:$0xff] }
 0x189   : > { %3743 = vmatprep.subr.bf16.mxu1 %v4472_v28  ;;  %v456_v28 = vld [vmem:[%s5247_s9 + $0x630] sm:$0xff]  ;;  %v4288_v32 = vcombine.high %v324_v24, %v328_v25  ;;  %v4287_v40 = vcombine.low %v324_v24, %v328_v25 }
 0x18a   : > { %3703 = vmatpush2.bf16.msra.mxu0 %v4343_v34  ;;  %v4416_v33 = vcombine.high %v452_v26, %v456_v28  ;;  %v572_v34 = vld [vmem:[%s5247_s9 + $0x9d0] sm:$0xff]  ;;  %v4415_v41 = vcombine.low %v452_v26, %v456_v28 }
 0x18b   : > { %3704 = vmatprep.subr.bf16.mxu0 %v4336_v37  ;;  %v700_v37 = vld [vmem:[%s5247_s9 + $0xdd0] sm:$0xff] }
 0x18c   : > { %3744 = vmatpush2.bf16.msra.mxu1 %v4471_v35  ;;  %v576_v35 = vld [vmem:[%s5247_s9 + $0x9f0] sm:$0xff] }
 0x18d   : > { %3745 = vmatprep.subr.bf16.mxu1 %v4464_v38  ;;  %v704_v38 = vld [vmem:[%s5247_s9 + $0xdf0] sm:$0xff]  ;;  %v4536_v42 = vcombine.high %v572_v34, %v576_v35  ;;  %v4535_v22 = vcombine.low %v572_v34, %v576_v35 }
 0x18e   : > { %3705 = vmatpush2.bf16.msra.mxu0 %v4335_v44  ;;  %v4664_v43 = vcombine.high %v700_v37, %v704_v38  ;;  %v564_v44 = vld [vmem:[%s5247_s9 + $0x990] sm:$0xff]  ;;  %v4663_v47 = vcombine.low %v700_v37, %v704_v38 }
 0x18f   : > { %3706 = vmatprep.subr.bf16.mxu0 %v4328_v45  ;;  %v692_v45 = vld [vmem:[%s5247_s9 + $0xd90] sm:$0xff] }
 0x190   : > { %3746 = vmatpush2.bf16.msra.mxu1 %v4463_v19  ;;  %v568_v19 = vld [vmem:[%s5247_s9 + $0x9b0] sm:$0xff] }
 0x191   : > { %3747 = vmatprep.subr.bf16.mxu1 %v4456_v46  ;;  %v696_v46 = vld [vmem:[%s5247_s9 + $0xdb0] sm:$0xff]  ;;  %v4528_v48 = vcombine.high %v564_v44, %v568_v19  ;;  %v4527_v17 = vcombine.low %v564_v44, %v568_v19 }
 0x192   : > { %3707 = vmatpush2.bf16.msra.mxu0 %v4327_v50  ;;  %v4656_v50 = vcombine.high %v692_v45, %v696_v46  ;;  %v684_v56 = vld [vmem:[%s5247_s9 + $0xd50] sm:$0xff] }
 0x193   : > { %3708 = vmatprep.subr.bf16.mxu0 %v4320_v52  ;;  %v560_v52 = vld [vmem:[%s5247_s9 + $0x970] sm:$0xff] }
 0x194   : > { %3748 = vmatpush2.bf16.msra.mxu1 %v4455_v51  ;;  %v556_v51 = vld [vmem:[%s5247_s9 + $0x950] sm:$0xff] }
 0x195   : > { %3749 = vmatprep.subr.bf16.mxu1 %v4448_v55  ;;  %v688_v57 = vld [vmem:[%s5247_s9 + $0xd70] sm:$0xff]  ;;  %v4519_v10 = vcombine.low %v556_v51, %v560_v52 }
 0x196   : > { %3709 = vmatpush2.bf16.msra.mxu0 %v4319_v62  ;;  %v4648_v53 = vcombine.high %v684_v56, %v688_v57  ;;  %v548_v54 = vld [vmem:[%s5247_s9 + $0x910] sm:$0xff]  ;;  %v4647_v12 = vcombine.low %v684_v56, %v688_v57 }
 0x197   : > { %3710 = vmatprep.subr.bf16.mxu0 %v4312_v0  ;;  %v4520_v0 = vcombine.high %v556_v51, %v560_v52  ;;  %v552_v3 = vld [vmem:[%s5247_s9 + $0x930] sm:$0xff] }
 0x198   : > { %3750 = vmatpush2.bf16.msra.mxu1 %v4447_v63  ;;  %v4655_v63 = vcombine.low %v692_v45, %v696_v46  ;;  %v676_v5 = vld [vmem:[%s5247_s9 + $0xd10] sm:$0xff]  ;;  %v4512_v13 = vcombine.high %v548_v54, %v552_v3  ;;  %v4511_v28 = vcombine.low %v548_v54, %v552_v3 }
 0x199   : > { %3751 = vmatprep.subr.bf16.mxu1 %v4440_v1  ;;  %v544_v24 = vld [vmem:[%s5247_s9 + $0x8f0] sm:$0xff] }
 0x19a   : > { %3711 = vmatpush2.bf16.msra.mxu0 %v4311_v6  ;;  %v680_v6 = vld [vmem:[%s5247_s9 + $0xd30] sm:$0xff] }
 0x19b   : > { %3712 = vmatprep.subr.bf16.mxu0 %v4304_v8  ;;  %v668_v25 = vld [vmem:[%s5247_s9 + $0xcd0] sm:$0xff] }
 0x19c   : > { %3752 = vmatpush2.bf16.msra.mxu1 %v4439_v7  ;;  %v672_v26 = vld [vmem:[%s5247_s9 + $0xcf0] sm:$0xff] }
 0x19d   : > { %3753 = vmatprep.subr.bf16.mxu1 %v4432_v9  ;;  %v536_v34 = vld [vmem:[%s5247_s9 + $0x8b0] sm:$0xff] }
 0x19e   : > { %3713 = vmatpush2.bf16.msra.mxu0 %v4303_v14  ;;  %v660_v35 = vld [vmem:[%s5247_s9 + $0xc90] sm:$0xff] }
 0x19f   : > { %3714 = vmatprep.subr.bf16.mxu0 %v4296_v18  ;;  %v4640_v18 = vcombine.high %v676_v5, %v680_v6  ;;  %v664_v37 = vld [vmem:[%s5247_s9 + $0xcb0] sm:$0xff] }
 0x1a0   : > { %3754 = vmatpush2.bf16.msra.mxu1 %v4431_v15  ;;  %v528_v44 = vld [vmem:[%s5247_s9 + $0x870] sm:$0xff] }
 0x1a1   : > { %3755 = vmatprep.subr.bf16.mxu1 %v4424_v21  ;;  %v540_v21 = vld [vmem:[%s5247_s9 + $0x8d0] sm:$0xff] }
 0x1a2   : > { %3715 = vmatpush2.bf16.msra.mxu0 %v4295_v30  ;;  %v4639_v30 = vcombine.low %v676_v5, %v680_v6  ;;  %v4503_v38 = vcombine.low %v540_v21, %v544_v24  ;;  %v652_v19 = vld [vmem:[%s5247_s9 + $0xc50] sm:$0xff] }
 0x1a3   : > { %3716 = vmatprep.subr.bf16.mxu0 %v4288_v32  ;;  %v4632_v32 = vcombine.high %v668_v25, %v672_v26  ;;  %v656_v45 = vld [vmem:[%s5247_s9 + $0xc70] sm:$0xff] }
 0x1a4   : > { %3756 = vmatpush2.bf16.msra.mxu1 %v4423_v31  ;;  %v4504_v31 = vcombine.high %v540_v21, %v544_v24  ;;  %v644_v51 = vld [vmem:[%s5247_s9 + $0xc10] sm:$0xff]  ;;  %v4615_v56 = vcombine.low %v652_v19, %v656_v45 }
 0x1a5   : > { %3757 = vmatprep.subr.bf16.mxu1 %v4416_v33  ;;  %v532_v33 = vld [vmem:[%s5247_s9 + $0x890] sm:$0xff] }
 0x1a6   : > { %3717 = vmatpush2.bf16.msra.mxu0 %v4287_v40  ;;  %v4631_v40 = vcombine.low %v668_v25, %v672_v26  ;;  %v4495_v46 = vcombine.low %v532_v33, %v536_v34  ;;  %v648_v52 = vld [vmem:[%s5247_s9 + $0xc30] sm:$0xff] }
 0x1a7   : > { %3768 = vmatprep.subr.bf16.mxu0 %v4536_v42  ;;  %v4624_v42 = vcombine.high %v660_v35, %v664_v37  ;;  %v632_v54 = vld [vmem:[%s5247_s9 + $0xbb0] sm:$0xff] }
 0x1a8   : > { %3758 = vmatpush2.bf16.msra.mxu1 %v4415_v41  ;;  %v4496_v41 = vcombine.high %v532_v33, %v536_v34  ;;  %v756_v3 = vld [vmem:[%s5247_s9 + $0xf90] sm:$0xff] }
 0x1a9   : > { %3809 = vmatprep.subr.bf16.mxu1 %v4664_v43  ;;  %v3474_v55 = vpop.f32.mrf.mxu0  ;;  %3719 = vmatmul.mubr.bf16.vlgmr.msra.gmra.mxu0 %v5341_v16  ;;  %v524_v43 = vld [vmem:[%s5247_s9 + $0x850] sm:$0xff] }
 0x1aa   : > { %v3475_v61 = vadd.f32 %v3474_v55, %v3434_v49  ;;  %3769 = vmatpush1.bf16.msra.mxu0 %v4535_v22  ;;  %3800 = vmatprep.mubr.bf16.mxu0 %v5359_v27  ;;  %v4623_v22 = vcombine.low %v660_v35, %v664_v37  ;;  %v516_v49 = vld [vmem:[%s5247_s9 + $0x810] sm:$0xff]  ;;  %v4487_v55 = vcombine.low %v524_v43, %v528_v44 }
 0x1ab   : > { %v3515_v62 = vpop.f32.mrf.mxu1  ;;  %3760 = vmatmul.mubr.bf16.vlgmr.msra.gmra.mxu1 %v5350_v20  ;;  %v3476_v23 = vpop.f32.mrf.mxu0  ;;  %3770 = vmatprep.subr.bf16.mxu0 %v4528_v48  ;;  %v4616_v48 = vcombine.high %v652_v19, %v656_v45  ;;  %v612_v21 = vld [vmem:[%s5247_s9 + $0xb10] sm:$0xff] }
 0x1ac   : > { %3810 = vmatpush1.bf16.msra.mxu1 %v4663_v47  ;;  %v3477_v1 = vadd.f32 %v3476_v23, %v3436_v60  ;;  %3841 = vmatprep.mubr.bf16.mxu1 %v5366_v29  ;;  %v3516_v7 = vadd.f32 %v3515_v62, %v3475_v61  ;;  %v4488_v47 = vcombine.high %v524_v43, %v528_v44  ;;  %v636_v61 = vld [vmem:[%s5247_s9 + $0xbd0] sm:$0xff] }
 0x1ad   : > { %v3517_v2 = vpop.f32.mrf.mxu1  ;;  %3811 = vmatprep.subr.bf16.mxu1 %v4656_v50  ;;  %v3478_v4 = vpop.f32.mrf.mxu0  ;;  %v520_v50 = vld [vmem:[%s5247_s9 + $0x830] sm:$0xff]  ;;  %v4608_v60 = vcombine.high %v644_v51, %v648_v52 }
 0x1ae   : > { %v3518_v8 = vadd.f32 %v3517_v2, %v3477_v1  ;;  %3771 = vmatpush1.bf16.msra.mxu0 %v4527_v17  ;;  %v4480_v57 = vcombine.high %v516_v49, %v520_v50  ;;  %v640_v62 = vld [vmem:[%s5247_s9 + $0xbf0] sm:$0xff] }
 0x1af   : > { %v3519_v9 = vpop.f32.mrf.mxu1  ;;  %v3479_v11 = vpop.f32.mrf.mxu0  ;;  %3772 = vmatprep.subr.bf16.mxu0 %v4520_v0  ;;  %v764_v17 = vld [vmem:[%s5247_s9 + $0xfd0] sm:$0xff]  ;;  %v4607_v0 = vcombine.low %v644_v51, %v648_v52  ;;  %v4600_v1 = vcombine.high %v636_v61, %v640_v62  ;;  %v4599_v5 = vcombine.low %v636_v61, %v640_v62 }
 0x1b0   : > { %3812 = vmatpush1.bf16.msra.mxu1 %v4655_v63  ;;  %v4742_v14 = vpack.c.bf16 %v3518_v8, %v3516_v7  ;;  %v768_v23 = vld [vmem:[%s5247_s9 + $0xff0] sm:$0xff]  ;;  %v4479_v63 = vcombine.low %v516_v49, %v520_v50 }
 0x1b1   : > { %v3520_v15 = vpop.f32.mrf.mxu1  ;;  %3813 = vmatprep.subr.bf16.mxu1 %v4648_v53  ;;  %v4728_v2 = vcombine.high %v764_v17, %v768_v23  ;;  %v628_v53 = vld [vmem:[%s5247_s9 + $0xb90] sm:$0xff]  ;;  %v4727_v6 = vcombine.low %v764_v17, %v768_v23 }
 0x1b2   : > { %4073 = vst [vmem:[%s5672_s8] sm:$0xff] %v4742_v14  ;;  %3773 = vmatpush1.bf16.msra.mxu0 %v4519_v10  ;;  %v760_v4 = vld [vmem:[%s5247_s9 + $0xfb0] sm:$0xff]  ;;  %v4592_v7 = vcombine.high %v628_v53, %v632_v54 }
 0x1b3   : > { %3774 = vmatprep.subr.bf16.mxu0 %v4512_v13  ;;  %v4720_v8 = vcombine.high %v756_v3, %v760_v4  ;;  %v620_v9 = vld [vmem:[%s5247_s9 + $0xb50] sm:$0xff]  ;;  %v4591_v13 = vcombine.low %v628_v53, %v632_v54  ;;  %v4719_v14 = vcombine.low %v756_v3, %v760_v4  ;;  %v317_v53 = vld [vmem:[%s5247_s9 + $0x1d8] sm:$0xff] }
 0x1b4   : > { %3814 = vmatpush1.bf16.msra.mxu1 %v4647_v12  ;;  %v624_v10 = vld [vmem:[%s5247_s9 + $0xb70] sm:$0xff]  ;;  %v321_v54 = vld [vmem:[%s5247_s9 + $0x1f8] sm:$0xff] }
 0x1b5   : > { %3815 = vmatprep.subr.bf16.mxu1 %v4640_v18  ;;  %v748_v11 = vld [vmem:[%s5247_s9 + $0xf50] sm:$0xff]  ;;  %v4584_v15 = vcombine.high %v620_v9, %v624_v10  ;;  %v445_v3 = vld [vmem:[%s5247_s9 + $0x5d8] sm:$0xff] }
 0x1b6   : > { %3775 = vmatpush1.bf16.msra.mxu0 %v4511_v28  ;;  %v752_v12 = vld [vmem:[%s5247_s9 + $0xf70] sm:$0xff]  ;;  %v4583_v28 = vcombine.low %v620_v9, %v624_v10  ;;  %v449_v4 = vld [vmem:[%s5247_s9 + $0x5f8] sm:$0xff] }
 0x1b7   : > { %3776 = vmatprep.subr.bf16.mxu0 %v4504_v31  ;;  %v4712_v18 = vcombine.high %v748_v11, %v752_v12  ;;  %v616_v24 = vld [vmem:[%s5247_s9 + $0xb30] sm:$0xff]  ;;  %v309_v9 = vld [vmem:[%s5247_s9 + $0x198] sm:$0xff] }
 0x1b8   : > { %3816 = vmatpush1.bf16.msra.mxu1 %v4639_v30  ;;  %v740_v25 = vld [vmem:[%s5247_s9 + $0xf10] sm:$0xff]  ;;  %v4711_v30 = vcombine.low %v748_v11, %v752_v12  ;;  %v4576_v31 = vcombine.high %v612_v21, %v616_v24  ;;  %v313_v10 = vld [vmem:[%s5247_s9 + $0x1b8] sm:$0xff] }
 0x1b9   : > { %3817 = vmatprep.subr.bf16.mxu1 %v4632_v32  ;;  %v744_v26 = vld [vmem:[%s5247_s9 + $0xf30] sm:$0xff]  ;;  %v437_v11 = vld [vmem:[%s5247_s9 + $0x598] sm:$0xff] }
 0x1ba   : > { %3777 = vmatpush1.bf16.msra.mxu0 %v4503_v38  ;;  %v4704_v32 = vcombine.high %v740_v25, %v744_v26  ;;  %v604_v33 = vld [vmem:[%s5247_s9 + $0xad0] sm:$0xff]  ;;  %v4575_v38 = vcombine.low %v612_v21, %v616_v24  ;;  %v441_v12 = vld [vmem:[%s5247_s9 + $0x5b8] sm:$0xff] }
 0x1bb   : > { %3778 = vmatprep.subr.bf16.mxu0 %v4496_v41  ;;  %v608_v34 = vld [vmem:[%s5247_s9 + $0xaf0] sm:$0xff]  ;;  %v301_v21 = vld [vmem:[%s5247_s9 + $0x158] sm:$0xff] }
 0x1bc   : > { %3818 = vmatpush1.bf16.msra.mxu1 %v4631_v40  ;;  %v732_v35 = vld [vmem:[%s5247_s9 + $0xed0] sm:$0xff]  ;;  %v4703_v40 = vcombine.low %v740_v25, %v744_v26  ;;  %v4568_v41 = vcombine.high %v604_v33, %v608_v34  ;;  %v305_v24 = vld [vmem:[%s5247_s9 + $0x178] sm:$0xff] }
 0x1bd   : > { %3819 = vmatprep.subr.bf16.mxu1 %v4624_v42  ;;  %v736_v37 = vld [vmem:[%s5247_s9 + $0xef0] sm:$0xff]  ;;  %v429_v26 = vld [vmem:[%s5247_s9 + $0x558] sm:$0xff] }
 0x1be   : > { %3779 = vmatpush1.bf16.msra.mxu0 %v4495_v46  ;;  %v4696_v42 = vcombine.high %v732_v35, %v736_v37  ;;  %v596_v43 = vld [vmem:[%s5247_s9 + $0xa90] sm:$0xff]  ;;  %v4567_v46 = vcombine.low %v604_v33, %v608_v34  ;;  %v4401_v33 = vcombine.low %v437_v11, %v441_v12  ;;  %v4266_v34 = vcombine.high %v301_v21, %v305_v24 }
 0x1bf   : > { %3780 = vmatprep.subr.bf16.mxu0 %v4488_v47  ;;  %v600_v44 = vld [vmem:[%s5247_s9 + $0xab0] sm:$0xff] }
 0x1c0   : > { %3820 = vmatpush1.bf16.msra.mxu1 %v4623_v22  ;;  %v724_v19 = vld [vmem:[%s5247_s9 + $0xe90] sm:$0xff]  ;;  %v4695_v22 = vcombine.low %v732_v35, %v736_v37  ;;  %v4560_v47 = vcombine.high %v596_v43, %v600_v44 }
 0x1c1   : > { %3821 = vmatprep.subr.bf16.mxu1 %v4616_v48  ;;  %v728_v45 = vld [vmem:[%s5247_s9 + $0xeb0] sm:$0xff] }
 0x1c2   : > { %3781 = vmatpush1.bf16.msra.mxu0 %v4487_v55  ;;  %v4688_v48 = vcombine.high %v724_v19, %v728_v45  ;;  %v588_v49 = vld [vmem:[%s5247_s9 + $0xa50] sm:$0xff]  ;;  %v4559_v55 = vcombine.low %v596_v43, %v600_v44  ;;  %v425_v43 = vld [vmem:[%s5247_s9 + $0x538] sm:$0xff] }
 0x1c3   : > { %3782 = vmatprep.subr.bf16.mxu0 %v4480_v57  ;;  %v592_v50 = vld [vmem:[%s5247_s9 + $0xa70] sm:$0xff] }
 0x1c4   : > { %3822 = vmatpush1.bf16.msra.mxu1 %v4615_v56  ;;  %v716_v51 = vld [vmem:[%s5247_s9 + $0xe50] sm:$0xff]  ;;  %v4687_v56 = vcombine.low %v724_v19, %v728_v45  ;;  %v4552_v57 = vcombine.high %v588_v49, %v592_v50  ;;  %v4265_v19 = vcombine.low %v301_v21, %v305_v24  ;;  %v509_v21 = vld [vmem:[%s5247_s9 + $0x7d8] sm:$0xff] }
 0x1c5   : > { %3823 = vmatprep.subr.bf16.mxu1 %v4608_v60  ;;  %v720_v52 = vld [vmem:[%s5247_s9 + $0xe70] sm:$0xff]  ;;  %v513_v24 = vld [vmem:[%s5247_s9 + $0x7f8] sm:$0xff] }
 0x1c6   : > { %3783 = vmatpush1.bf16.msra.mxu0 %v4479_v63  ;;  %v4680_v60 = vcombine.high %v716_v51, %v720_v52  ;;  %v580_v61 = vld [vmem:[%s5247_s9 + $0xa10] sm:$0xff]  ;;  %v4551_v63 = vcombine.low %v588_v49, %v592_v50  ;;  %v289_v49 = vld [vmem:[%s5247_s9 + $0xf8] sm:$0xff] }
 0x1c7   : > { %3784 = vmatprep.subr.bf16.mxu0 %v4600_v1  ;;  %v584_v62 = vld [vmem:[%s5247_s9 + $0xa30] sm:$0xff]  ;;  %v413_v50 = vld [vmem:[%s5247_s9 + $0x4d8] sm:$0xff] }
 0x1c8   : > { %3824 = vmatpush1.bf16.msra.mxu1 %v4607_v0  ;;  %v708_v17 = vld [vmem:[%s5247_s9 + $0xe10] sm:$0xff]  ;;  %v4679_v0 = vcombine.low %v716_v51, %v720_v52  ;;  %v4544_v1 = vcombine.high %v580_v61, %v584_v62  ;;  %v417_v51 = vld [vmem:[%s5247_s9 + $0x4f8] sm:$0xff] }
 0x1c9   : > { %3825 = vmatprep.subr.bf16.mxu1 %v4728_v2  ;;  %v712_v23 = vld [vmem:[%s5247_s9 + $0xe30] sm:$0xff] }
 0x1ca   : > { %3785 = vmatpush2.bf16.msra.mxu0 %v4599_v5  ;;  %v4672_v2 = vcombine.high %v708_v17, %v712_v23  ;;  %v4543_v5 = vcombine.low %v580_v61, %v584_v62  ;;  %v405_v61 = vld [vmem:[%s5247_s9 + $0x498] sm:$0xff] }
 0x1cb   : > { %3786 = vmatprep.subr.bf16.mxu0 %v4592_v7  ;;  %v4282_v7 = vcombine.high %v317_v53, %v321_v54  ;;  %v409_v62 = vld [vmem:[%s5247_s9 + $0x4b8] sm:$0xff] }
 0x1cc   : > { %3826 = vmatpush2.bf16.msra.mxu1 %v4727_v6  ;;  %v4671_v6 = vcombine.low %v708_v17, %v712_v23  ;;  %v4377_v23 = vcombine.low %v413_v50, %v417_v51 }
 0x1cd   : > { %3827 = vmatprep.subr.bf16.mxu1 %v4720_v8  ;;  %v4410_v8 = vcombine.high %v445_v3, %v449_v4 }
 0x1ce   : > { %3787 = vmatpush2.bf16.msra.mxu0 %v4591_v13  ;;  %v4281_v13 = vcombine.low %v317_v53, %v321_v54  ;;  %v397_v53 = vld [vmem:[%s5247_s9 + $0x458] sm:$0xff] }
 0x1cf   : > { %3788 = vmatprep.subr.bf16.mxu0 %v4584_v15  ;;  %v4274_v15 = vcombine.high %v309_v9, %v313_v10  ;;  %v401_v54 = vld [vmem:[%s5247_s9 + $0x478] sm:$0xff] }
 0x1d0   : > { %3828 = vmatpush2.bf16.msra.mxu1 %v4719_v14  ;;  %v4409_v14 = vcombine.low %v445_v3, %v449_v4  ;;  %v4369_v4 = vcombine.low %v405_v61, %v409_v62 }
 0x1d1   : > { %3829 = vmatprep.subr.bf16.mxu1 %v4712_v18  ;;  %v4402_v18 = vcombine.high %v437_v11, %v441_v12  ;;  %v4361_v12 = vcombine.low %v397_v53, %v401_v54 }
 0x1d2   : > { %3789 = vmatpush2.bf16.msra.mxu0 %v4583_v28  ;;  %v433_v28 = vld [vmem:[%s5247_s9 + $0x578] sm:$0xff] }
 0x1d3   : > { %3790 = vmatprep.subr.bf16.mxu0 %v4576_v31  ;;  %v4273_v31 = vcombine.low %v309_v9, %v313_v10  ;;  %v4394_v37 = vcombine.high %v429_v26, %v433_v28  ;;  %v389_v9 = vld [vmem:[%s5247_s9 + $0x418] sm:$0xff] }
 0x1d4   : > { %3830 = vmatpush2.bf16.msra.mxu1 %v4711_v30  ;;  %v393_v10 = vld [vmem:[%s5247_s9 + $0x438] sm:$0xff] }
 0x1d5   : > { %3831 = vmatprep.subr.bf16.mxu1 %v4704_v32 }
 0x1d6   : > { %3791 = vmatpush2.bf16.msra.mxu0 %v4575_v38  ;;  %v293_v38 = vld [vmem:[%s5247_s9 + $0x118] sm:$0xff] }
 0x1d7   : > { %3792 = vmatprep.subr.bf16.mxu0 %v4568_v41 }
 0x1d8   : > { %3832 = vmatpush2.bf16.msra.mxu1 %v4703_v40  ;;  %v297_v40 = vld [vmem:[%s5247_s9 + $0x138] sm:$0xff] }
 0x1d9   : > { %3833 = vmatprep.subr.bf16.mxu1 %v4696_v42  ;;  %v421_v42 = vld [vmem:[%s5247_s9 + $0x518] sm:$0xff] }
 0x1da   : > { %3793 = vmatpush2.bf16.msra.mxu0 %v4567_v46  ;;  %v4393_v46 = vcombine.low %v429_v26, %v433_v28  ;;  %v4385_v52 = vcombine.low %v421_v42, %v425_v43  ;;  %v4353_v28 = vcombine.low %v389_v9, %v393_v10 }
 0x1db   : > { %3794 = vmatprep.subr.bf16.mxu0 %v4560_v47 }
 0x1dc   : > { %3834 = vmatpush2.bf16.msra.mxu1 %v4695_v22  ;;  %v4258_v22 = vcombine.high %v293_v38, %v297_v40 }
 0x1dd   : > { %3835 = vmatprep.subr.bf16.mxu1 %v4688_v48  ;;  %v285_v48 = vld [vmem:[%s5247_s9 + $0xd8] sm:$0xff] }
 0x1de   : > { %3795 = vmatpush2.bf16.msra.mxu0 %v4559_v55  ;;  %v4250_v55 = vcombine.high %v285_v48, %v289_v49  ;;  %v4249_v17 = vcombine.low %v285_v48, %v289_v49 }
 0x1df   : > { %3796 = vmatprep.subr.bf16.mxu0 %v4552_v57  ;;  %v277_v57 = vld [vmem:[%s5247_s9 + $0x98] sm:$0xff] }
 0x1e0   : > { %3836 = vmatpush2.bf16.msra.mxu1 %v4687_v56  ;;  %v4378_v56 = vcombine.high %v413_v50, %v417_v51  ;;  %v357_v50 = vld [vmem:[%s5247_s9 + $0x318] sm:$0xff] }
 0x1e1   : > { %3837 = vmatprep.subr.bf16.mxu1 %v4680_v60  ;;  %v281_v60 = vld [vmem:[%s5247_s9 + $0xb8] sm:$0xff] }
 0x1e2   : > { %3797 = vmatpush2.bf16.msra.mxu0 %v4551_v63  ;;  %v4242_v63 = vcombine.high %v277_v57, %v281_v60  ;;  %v4241_v3 = vcombine.low %v277_v57, %v281_v60  ;;  %v361_v51 = vld [vmem:[%s5247_s9 + $0x338] sm:$0xff] }
 0x1e3   : > { %3798 = vmatprep.subr.bf16.mxu0 %v4544_v1  ;;  %v269_v1 = vld [vmem:[%s5247_s9 + $0x58] sm:$0xff]  ;;  %v4322_v57 = vcombine.high %v357_v50, %v361_v51 }
 0x1e4   : > { %3838 = vmatpush2.bf16.msra.mxu1 %v4679_v0  ;;  %v4370_v0 = vcombine.high %v405_v61, %v409_v62  ;;  %v349_v61 = vld [vmem:[%s5247_s9 + $0x2d8] sm:$0xff] }
 0x1e5   : > { %3839 = vmatprep.subr.bf16.mxu1 %v4672_v2  ;;  %v273_v2 = vld [vmem:[%s5247_s9 + $0x78] sm:$0xff] }
 0x1e6   : > { %3799 = vmatpush2.bf16.msra.mxu0 %v4543_v5  ;;  %v4234_v5 = vcombine.high %v269_v1, %v273_v2  ;;  %v4233_v11 = vcombine.low %v269_v1, %v273_v2  ;;  %v353_v62 = vld [vmem:[%s5247_s9 + $0x2f8] sm:$0xff] }
 0x1e7   : > { %3850 = vmatprep.subr.bf16.mxu0 %v4282_v7  ;;  %v261_v7 = vld [vmem:[%s5247_s9 + $0x18] sm:$0xff]  ;;  %v4314_v1 = vcombine.high %v349_v61, %v353_v62 }
 0x1e8   : > { %3840 = vmatpush2.bf16.msra.mxu1 %v4671_v6  ;;  %v4362_v6 = vcombine.high %v397_v53, %v401_v54  ;;  %v341_v53 = vld [vmem:[%s5247_s9 + $0x298] sm:$0xff] }
 0x1e9   : > { %3891 = vmatprep.subr.bf16.mxu1 %v4410_v8  ;;  %v5729_v25 = vpop.f32.mrf.mxu0  ;;  %3801 = vmatmul.mubr.bf16.vlgmr.msra.gmra.mxu0 %v5431_v36  ;;  %v265_v8 = vld [vmem:[%s5247_s9 + $0x38] sm:$0xff] }
 0x1ea   : > { %3851 = vmatpush1.bf16.msra.mxu0 %v4281_v13  ;;  %3882 = vmatprep.mubr.bf16.mxu0 %v5291_v58  ;;  %v4386_v58 = vcombine.high %v421_v42, %v425_v43  ;;  %v4226_v13 = vcombine.high %v261_v7, %v265_v8  ;;  %v4225_v26 = vcombine.low %v261_v7, %v265_v8  ;;  %v345_v54 = vld [vmem:[%s5247_s9 + $0x2b8] sm:$0xff] }
 0x1eb   : > { %v5734_v30 = vpop.f32.mrf.mxu1  ;;  %3842 = vmatmul.mubr.bf16.vlgmr.msra.gmra.mxu1 %v5437_v39  ;;  %v5737_v32 = vpop.f32.mrf.mxu0  ;;  %3852 = vmatprep.subr.bf16.mxu0 %v4274_v15  ;;  %v381_v15 = vld [vmem:[%s5247_s9 + $0x3d8] sm:$0xff]  ;;  %v4473_v42 = vcombine.low %v509_v21, %v513_v24  ;;  %v4306_v7 = vcombine.high %v341_v53, %v345_v54 }
 0x1ec   : > { %3892 = vmatpush1.bf16.msra.mxu1 %v4409_v14  ;;  %3923 = vmatprep.mubr.bf16.mxu1 %v5295_v59  ;;  %v4257_v59 = vcombine.low %v293_v38, %v297_v40  ;;  %v4354_v14 = vcombine.high %v389_v9, %v393_v10  ;;  %v501_v38 = vld [vmem:[%s5247_s9 + $0x798] sm:$0xff] }
 0x1ed   : > { %v5739_v35 = vpop.f32.mrf.mxu1  ;;  %3893 = vmatprep.subr.bf16.mxu1 %v4402_v18  ;;  %v3560_v41 = vpop.f32.mrf.mxu0  ;;  %v385_v18 = vld [vmem:[%s5247_s9 + $0x3f8] sm:$0xff] }
 0x1ee   : > { %3853 = vmatpush1.bf16.msra.mxu0 %v4273_v31  ;;  %v4346_v31 = vcombine.high %v381_v15, %v385_v18  ;;  %v505_v40 = vld [vmem:[%s5247_s9 + $0x7b8] sm:$0xff]  ;;  %v4345_v41 = vcombine.low %v381_v15, %v385_v18 }
 0x1ef   : > { %v3601_v44 = vpop.f32.mrf.mxu1  ;;  %v3561_v45 = vpop.f32.mrf.mxu0  ;;  %3854 = vmatprep.subr.bf16.mxu0 %v4266_v34  ;;  %v373_v34 = vld [vmem:[%s5247_s9 + $0x398] sm:$0xff] }
 0x1f0   : > { %3894 = vmatpush1.bf16.msra.mxu1 %v4401_v33  ;;  %v4474_v33 = vcombine.high %v509_v21, %v513_v24  ;;  %v4466_v44 = vcombine.high %v501_v38, %v505_v40  ;;  %v369_v45 = vld [vmem:[%s5247_s9 + $0x378] sm:$0xff] }
 0x1f1   : > { %v3602_v47 = vpop.f32.mrf.mxu1  ;;  %3895 = vmatprep.subr.bf16.mxu1 %v4394_v37  ;;  %v377_v37 = vld [vmem:[%s5247_s9 + $0x3b8] sm:$0xff] }
 0x1f2   : > { %3855 = vmatpush1.bf16.msra.mxu0 %v4265_v19  ;;  %v4338_v43 = vcombine.high %v373_v34, %v377_v37  ;;  %v365_v19 = vld [vmem:[%s5247_s9 + $0x358] sm:$0xff]  ;;  %v4337_v47 = vcombine.low %v373_v34, %v377_v37 }
 0x1f3   : > { %3856 = vmatprep.subr.bf16.mxu0 %v4258_v22  ;;  %v497_v22 = vld [vmem:[%s5247_s9 + $0x778] sm:$0xff]  ;;  %v4330_v48 = vcombine.high %v365_v19, %v369_v45 }
 0x1f4   : > { %3896 = vmatpush1.bf16.msra.mxu1 %v4393_v46  ;;  %v493_v46 = vld [vmem:[%s5247_s9 + $0x758] sm:$0xff] }
 0x1f5   : > { %3897 = vmatprep.subr.bf16.mxu1 %v4386_v58  ;;  %v4465_v58 = vcombine.low %v501_v38, %v505_v40  ;;  %v4458_v49 = vcombine.high %v493_v46, %v497_v22  ;;  %v333_v9 = vld [vmem:[%s5247_s9 + $0x258] sm:$0xff] }
 0x1f6   : > { %3857 = vmatpush1.bf16.msra.mxu0 %v4257_v59  ;;  %v485_v59 = vld [vmem:[%s5247_s9 + $0x718] sm:$0xff] }
 0x1f7   : > { %3858 = vmatprep.subr.bf16.mxu0 %v4250_v55  ;;  %v4329_v55 = vcombine.low %v365_v19, %v369_v45  ;;  %v337_v10 = vld [vmem:[%s5247_s9 + $0x278] sm:$0xff] }
 0x1f8   : > { %3898 = vmatpush1.bf16.msra.mxu1 %v4385_v52  ;;  %v489_v52 = vld [vmem:[%s5247_s9 + $0x738] sm:$0xff]  ;;  %v4298_v15 = vcombine.high %v333_v9, %v337_v10 }
 0x1f9   : > { %3899 = vmatprep.subr.bf16.mxu1 %v4378_v56  ;;  %v4457_v56 = vcombine.low %v493_v46, %v497_v22  ;;  %v4450_v60 = vcombine.high %v485_v59, %v489_v52  ;;  %v325_v21 = vld [vmem:[%s5247_s9 + $0x218] sm:$0xff] }
 0x1fa   : > { %3859 = vmatpush1.bf16.msra.mxu0 %v4249_v17  ;;  %v477_v17 = vld [vmem:[%s5247_s9 + $0x6d8] sm:$0xff] }
 0x1fb   : > { %3860 = vmatprep.subr.bf16.mxu0 %v4242_v63  ;;  %v4321_v63 = vcombine.low %v357_v50, %v361_v51  ;;  %v329_v24 = vld [vmem:[%s5247_s9 + $0x238] sm:$0xff]  ;;  %v3598_v51 = vadd.f32 %v5734_v30, %v5729_v25 }
 0x1fc   : > { %3900 = vmatpush1.bf16.msra.mxu1 %v4377_v23  ;;  %v481_v23 = vld [vmem:[%s5247_s9 + $0x6f8] sm:$0xff]  ;;  %v4290_v34 = vcombine.high %v325_v21, %v329_v24 }
 0x1fd   : > { %3901 = vmatprep.subr.bf16.mxu1 %v4370_v0  ;;  %v4449_v0 = vcombine.low %v485_v59, %v489_v52  ;;  %v4442_v2 = vcombine.high %v477_v17, %v481_v23  ;;  %v573_v38 = vld [vmem:[%s5247_s9 + $0x9d8] sm:$0xff] }
 0x1fe   : > { %3861 = vmatpush1.bf16.msra.mxu0 %v4241_v3  ;;  %v469_v3 = vld [vmem:[%s5247_s9 + $0x698] sm:$0xff] }
 0x1ff   : > { %3862 = vmatprep.subr.bf16.mxu0 %v4234_v5  ;;  %v4313_v5 = vcombine.low %v349_v61, %v353_v62  ;;  %v577_v40 = vld [vmem:[%s5247_s9 + $0x9f8] sm:$0xff]  ;;  %v3600_v61 = vadd.f32 %v5739_v35, %v5737_v32 }
 0x200   : > { %3902 = vmatpush1.bf16.msra.mxu1 %v4369_v4  ;;  %v473_v4 = vld [vmem:[%s5247_s9 + $0x6b8] sm:$0xff]  ;;  %v4538_v19 = vcombine.high %v573_v38, %v577_v40 }
 0x201   : > { %3903 = vmatprep.subr.bf16.mxu1 %v4362_v6  ;;  %v4441_v6 = vcombine.low %v477_v17, %v481_v23  ;;  %v4434_v8 = vcombine.high %v469_v3, %v473_v4  ;;  %v565_v46 = vld [vmem:[%s5247_s9 + $0x998] sm:$0xff] }
 0x202   : > { %3863 = vmatpush1.bf16.msra.mxu0 %v4233_v11  ;;  %v461_v11 = vld [vmem:[%s5247_s9 + $0x658] sm:$0xff] }
 0x203   : > { %3864 = vmatprep.subr.bf16.mxu0 %v4226_v13  ;;  %v4305_v13 = vcombine.low %v341_v53, %v345_v54  ;;  %v569_v22 = vld [vmem:[%s5247_s9 + $0x9b8] sm:$0xff] }
 0x204   : > { %3904 = vmatpush1.bf16.msra.mxu1 %v4361_v12  ;;  %v465_v12 = vld [vmem:[%s5247_s9 + $0x678] sm:$0xff]  ;;  %v4530_v50 = vcombine.high %v565_v46, %v569_v22  ;;  %v4529_v25 = vcombine.low %v565_v46, %v569_v22 }
 0x205   : > { %3905 = vmatprep.subr.bf16.mxu1 %v4354_v14  ;;  %v4433_v14 = vcombine.low %v469_v3, %v473_v4  ;;  %v4426_v18 = vcombine.high %v461_v11, %v465_v12  ;;  %v557_v52 = vld [vmem:[%s5247_s9 + $0x958] sm:$0xff] }
 0x206   : > { %3865 = vmatpush1.bf16.msra.mxu0 %v4225_v26  ;;  %v453_v26 = vld [vmem:[%s5247_s9 + $0x618] sm:$0xff] }
 0x207   : > { %3866 = vmatprep.subr.bf16.mxu0 %v4346_v31  ;;  %v4297_v31 = vcombine.low %v333_v9, %v337_v10  ;;  %v553_v32 = vld [vmem:[%s5247_s9 + $0x938] sm:$0xff] }
 0x208   : > { %3906 = vmatpush1.bf16.msra.mxu1 %v4353_v28  ;;  %v457_v28 = vld [vmem:[%s5247_s9 + $0x638] sm:$0xff] }
 0x209   : > { %3907 = vmatprep.subr.bf16.mxu1 %v4474_v33  ;;  %v4425_v33 = vcombine.low %v461_v11, %v465_v12  ;;  %v4418_v37 = vcombine.high %v453_v26, %v457_v28  ;;  %v677_v53 = vld [vmem:[%s5247_s9 + $0xd18] sm:$0xff] }
 0x20a   : > { %3867 = vmatpush2.bf16.msra.mxu0 %v4345_v41  ;;  %v701_v41 = vld [vmem:[%s5247_s9 + $0xdd8] sm:$0xff] }
 0x20b   : > { %3868 = vmatprep.subr.bf16.mxu0 %v4338_v43  ;;  %v4289_v43 = vcombine.low %v325_v21, %v329_v24  ;;  %v541_v10 = vld [vmem:[%s5247_s9 + $0x8d8] sm:$0xff] }
 0x20c   : > { %3908 = vmatpush2.bf16.msra.mxu1 %v4473_v42  ;;  %v705_v42 = vld [vmem:[%s5247_s9 + $0xdf8] sm:$0xff] }
 0x20d   : > { %3909 = vmatprep.subr.bf16.mxu1 %v4466_v44  ;;  %v4417_v44 = vcombine.low %v453_v26, %v457_v28  ;;  %v4666_v45 = vcombine.high %v701_v41, %v705_v42  ;;  %v545_v11 = vld [vmem:[%s5247_s9 + $0x8f8] sm:$0xff] }
 0x20e   : > { %3869 = vmatpush2.bf16.msra.mxu0 %v4337_v47  ;;  %v693_v47 = vld [vmem:[%s5247_s9 + $0xd98] sm:$0xff] }
 0x20f   : > { %3870 = vmatprep.subr.bf16.mxu0 %v4330_v48  ;;  %v4537_v48 = vcombine.low %v573_v38, %v577_v40  ;;  %v669_v12 = vld [vmem:[%s5247_s9 + $0xcd8] sm:$0xff] }
 0x210   : > { %3910 = vmatpush2.bf16.msra.mxu1 %v4465_v58  ;;  %v697_v58 = vld [vmem:[%s5247_s9 + $0xdb8] sm:$0xff] }
 0x211   : > { %3911 = vmatprep.subr.bf16.mxu1 %v4458_v49  ;;  %v4665_v49 = vcombine.low %v701_v41, %v705_v42  ;;  %v4658_v59 = vcombine.high %v693_v47, %v697_v58  ;;  %v4657_v23 = vcombine.low %v693_v47, %v697_v58  ;;  %v533_v24 = vld [vmem:[%s5247_s9 + $0x898] sm:$0xff] }
 0x212   : > { %3871 = vmatpush2.bf16.msra.mxu0 %v4329_v55  ;;  %v561_v55 = vld [vmem:[%s5247_s9 + $0x978] sm:$0xff] }
 0x213   : > { %3872 = vmatprep.subr.bf16.mxu0 %v4322_v57  ;;  %v685_v57 = vld [vmem:[%s5247_s9 + $0xd58] sm:$0xff] }
 0x214   : > { %3912 = vmatpush2.bf16.msra.mxu1 %v4457_v56  ;;  %v537_v26 = vld [vmem:[%s5247_s9 + $0x8b8] sm:$0xff] }
 0x215   : > { %3913 = vmatprep.subr.bf16.mxu1 %v4450_v60  ;;  %v689_v60 = vld [vmem:[%s5247_s9 + $0xd78] sm:$0xff] }
 0x216   : > { %3873 = vmatpush2.bf16.msra.mxu0 %v4321_v63  ;;  %v661_v28 = vld [vmem:[%s5247_s9 + $0xc98] sm:$0xff] }
 0x217   : > { %3874 = vmatprep.subr.bf16.mxu0 %v4314_v1  ;;  %v4650_v1 = vcombine.high %v685_v57, %v689_v60  ;;  %v525_v40 = vld [vmem:[%s5247_s9 + $0x858] sm:$0xff] }
 0x218   : > { %3914 = vmatpush2.bf16.msra.mxu1 %v4449_v0  ;;  %v529_v41 = vld [vmem:[%s5247_s9 + $0x878] sm:$0xff] }
 0x219   : > { %3915 = vmatprep.subr.bf16.mxu1 %v4442_v2  ;;  %v549_v2 = vld [vmem:[%s5247_s9 + $0x918] sm:$0xff] }
 0x21a   : > { %3875 = vmatpush2.bf16.msra.mxu0 %v4313_v5  ;;  %v4521_v5 = vcombine.low %v557_v52, %v561_v55  ;;  %v653_v42 = vld [vmem:[%s5247_s9 + $0xc58] sm:$0xff] }
 0x21b   : > { %3876 = vmatprep.subr.bf16.mxu0 %v4306_v7  ;;  %v4649_v7 = vcombine.low %v685_v57, %v689_v60  ;;  %v517_v22 = vld [vmem:[%s5247_s9 + $0x818] sm:$0xff] }
 0x21c   : > { %3916 = vmatpush2.bf16.msra.mxu1 %v4441_v6  ;;  %v521_v47 = vld [vmem:[%s5247_s9 + $0x838] sm:$0xff] }
 0x21d   : > { %3917 = vmatprep.subr.bf16.mxu1 %v4434_v8  ;;  %v645_v58 = vld [vmem:[%s5247_s9 + $0xc18] sm:$0xff]  ;;  %v4481_v60 = vcombine.low %v517_v22, %v521_v47 }
 0x21e   : > { %3877 = vmatpush2.bf16.msra.mxu0 %v4305_v13  ;;  %v673_v13 = vld [vmem:[%s5247_s9 + $0xcf8] sm:$0xff] }
 0x21f   : > { %3878 = vmatprep.subr.bf16.mxu0 %v4298_v15  ;;  %v4634_v21 = vcombine.high %v669_v12, %v673_v13  ;;  %v769_v57 = vld [vmem:[%s5247_s9 + $0xff8] sm:$0xff] }
 0x220   : > { %3918 = vmatpush2.bf16.msra.mxu1 %v4433_v14  ;;  %v4513_v14 = vcombine.low %v549_v2, %v553_v32 }
 0x221   : > { %3919 = vmatprep.subr.bf16.mxu1 %v4426_v18  ;;  %v4506_v18 = vcombine.high %v541_v10, %v545_v11 }
 0x222   : > { %3879 = vmatpush2.bf16.msra.mxu0 %v4297_v31  ;;  %v665_v31 = vld [vmem:[%s5247_s9 + $0xcb8] sm:$0xff] }
 0x223   : > { %3880 = vmatprep.subr.bf16.mxu0 %v4290_v34  ;;  %v4633_v34 = vcombine.low %v669_v12, %v673_v13  ;;  %v4626_v38 = vcombine.high %v661_v28, %v665_v31  ;;  %v605_v12 = vld [vmem:[%s5247_s9 + $0xad8] sm:$0xff] }
 0x224   : > { %3920 = vmatpush2.bf16.msra.mxu1 %v4425_v33  ;;  %v4505_v33 = vcombine.low %v541_v10, %v545_v11  ;;  %v609_v13 = vld [vmem:[%s5247_s9 + $0xaf8] sm:$0xff] }
 0x225   : > { %3921 = vmatprep.subr.bf16.mxu1 %v4418_v37  ;;  %v4498_v37 = vcombine.high %v533_v24, %v537_v26 }
 0x226   : > { %3881 = vmatpush2.bf16.msra.mxu0 %v4289_v43  ;;  %v657_v43 = vld [vmem:[%s5247_s9 + $0xc78] sm:$0xff] }
 0x227   : > { %3932 = vmatprep.subr.bf16.mxu0 %v4538_v19  ;;  %v4625_v19 = vcombine.low %v661_v28, %v665_v31  ;;  %v4618_v46 = vcombine.high %v653_v42, %v657_v43  ;;  %v597_v28 = vld [vmem:[%s5247_s9 + $0xa98] sm:$0xff] }
 0x228   : > { %3922 = vmatpush2.bf16.msra.mxu1 %v4417_v44  ;;  %v4497_v44 = vcombine.low %v533_v24, %v537_v26  ;;  %v4570_v24 = vcombine.high %v605_v12, %v609_v13  ;;  %v601_v31 = vld [vmem:[%s5247_s9 + $0xab8] sm:$0xff] }
 0x229   : > { %3973 = vmatprep.subr.bf16.mxu1 %v4666_v45  ;;  %v3638_v56 = vpop.f32.mrf.mxu0  ;;  %3883 = vmatmul.mubr.bf16.vlgmr.msra.gmra.mxu0 %v5341_v16  ;;  %v4522_v16 = vcombine.high %v557_v52, %v561_v55  ;;  %v4490_v45 = vcombine.high %v525_v40, %v529_v41  ;;  %v637_v52 = vld [vmem:[%s5247_s9 + $0xbd8] sm:$0xff] }
 0x22a   : > { %v3639_v62 = vadd.f32 %v3638_v56, %v3598_v51  ;;  %3933 = vmatpush1.bf16.msra.mxu0 %v4537_v48  ;;  %3964 = vmatprep.mubr.bf16.mxu0 %v5359_v27  ;;  %v4514_v27 = vcombine.high %v549_v2, %v553_v32  ;;  %v649_v48 = vld [vmem:[%s5247_s9 + $0xc38] sm:$0xff]  ;;  %v4482_v51 = vcombine.high %v517_v22, %v521_v47 }
 0x22b   : > { %v3679_v17 = vpop.f32.mrf.mxu1  ;;  %3924 = vmatmul.mubr.bf16.vlgmr.msra.gmra.mxu1 %v5350_v20  ;;  %v3640_v30 = vpop.f32.mrf.mxu0  ;;  %3934 = vmatprep.subr.bf16.mxu0 %v4530_v50  ;;  %v681_v20 = vld [vmem:[%s5247_s9 + $0xd38] sm:$0xff]  ;;  %v4617_v50 = vcombine.low %v653_v42, %v657_v43 }
 0x22c   : > { %3974 = vmatpush1.bf16.msra.mxu1 %v4665_v49  ;;  %v3641_v63 = vadd.f32 %v3640_v30, %v3600_v61  ;;  %4005 = vmatprep.mubr.bf16.mxu1 %v5366_v29  ;;  %v3680_v54 = vadd.f32 %v3679_v17, %v3639_v62  ;;  %v4642_v29 = vcombine.high %v677_v53, %v681_v20  ;;  %v641_v55 = vld [vmem:[%s5247_s9 + $0xbf8] sm:$0xff] }
 0x22d   : > { %v3681_v0 = vpop.f32.mrf.mxu1  ;;  %3975 = vmatprep.subr.bf16.mxu1 %v4658_v59  ;;  %v3642_v35 = vpop.f32.mrf.mxu0  ;;  %v4641_v15 = vcombine.low %v677_v53, %v681_v20  ;;  %v4489_v49 = vcombine.low %v525_v40, %v529_v41  ;;  %v4610_v59 = vcombine.high %v645_v58, %v649_v48  ;;  %v765_v56 = vld [vmem:[%s5247_s9 + $0xfd8] sm:$0xff]  ;;  %v4609_v61 = vcombine.low %v645_v58, %v649_v48 }
 0x22e   : > { %v3682_v3 = vadd.f32 %v3681_v0, %v3641_v63  ;;  %3935 = vmatpush1.bf16.msra.mxu0 %v4529_v25  ;;  %v4602_v62 = vcombine.high %v637_v52, %v641_v55  ;;  %v4730_v17 = vcombine.high %v765_v56, %v769_v57  ;;  %v629_v25 = vld [vmem:[%s5247_s9 + $0xb98] sm:$0xff]  ;;  %v4601_v63 = vcombine.low %v637_v52, %v641_v55 }
 0x22f   : > { %v3683_v4 = vpop.f32.mrf.mxu1  ;;  %v3643_v6 = vpop.f32.mrf.mxu0  ;;  %3936 = vmatprep.subr.bf16.mxu0 %v4522_v16  ;;  %v633_v30 = vld [vmem:[%s5247_s9 + $0xbb8] sm:$0xff]  ;;  %v4729_v0 = vcombine.low %v765_v56, %v769_v57  ;;  %v4562_v40 = vcombine.high %v597_v28, %v601_v31 }
 0x230   : > { %3976 = vmatpush1.bf16.msra.mxu1 %v4657_v23  ;;  %v4743_v8 = vpack.c.bf16 %v3682_v3, %v3680_v54  ;;  %v757_v23 = vld [vmem:[%s5247_s9 + $0xf98] sm:$0xff]  ;;  %v4593_v54 = vcombine.low %v629_v25, %v633_v30 }
 0x231   : > { %v3684_v9 = vpop.f32.mrf.mxu1  ;;  %3977 = vmatprep.subr.bf16.mxu1 %v4650_v1  ;;  %v761_v16 = vld [vmem:[%s5247_s9 + $0xfb8] sm:$0xff]  ;;  %v4594_v1 = vcombine.high %v629_v25, %v633_v30 }
 0x232   : > { %4074 = vst [vmem:[%s5672_s8 + $0x8] sm:$0xff] %v4743_v8  ;;  %3937 = vmatpush1.bf16.msra.mxu0 %v4521_v5  ;;  %v4722_v2 = vcombine.high %v757_v23, %v761_v16  ;;  %v621_v32 = vld [vmem:[%s5247_s9 + $0xb58] sm:$0xff]  ;;  %v4721_v3 = vcombine.low %v757_v23, %v761_v16 }
 0x233   : > { %3938 = vmatprep.subr.bf16.mxu0 %v4514_v27  ;;  %v625_v35 = vld [vmem:[%s5247_s9 + $0xb78] sm:$0xff] }
 0x234   : > { %3978 = vmatpush1.bf16.msra.mxu1 %v4649_v7  ;;  %v749_v53 = vld [vmem:[%s5247_s9 + $0xf58] sm:$0xff]  ;;  %v4586_v4 = vcombine.high %v621_v32, %v625_v35  ;;  %v4585_v9 = vcombine.low %v621_v32, %v625_v35 }
 0x235   : > { %3979 = vmatprep.subr.bf16.mxu1 %v4642_v29  ;;  %v753_v20 = vld [vmem:[%s5247_s9 + $0xf78] sm:$0xff] }
 0x236   : > { %3939 = vmatpush1.bf16.msra.mxu0 %v4513_v14  ;;  %v4714_v5 = vcombine.high %v749_v53, %v753_v20  ;;  %v613_v6 = vld [vmem:[%s5247_s9 + $0xb18] sm:$0xff]  ;;  %v4713_v29 = vcombine.low %v749_v53, %v753_v20 }
 0x237   : > { %3940 = vmatprep.subr.bf16.mxu0 %v4506_v18  ;;  %v617_v7 = vld [vmem:[%s5247_s9 + $0xb38] sm:$0xff] }
 0x238   : > { %3980 = vmatpush1.bf16.msra.mxu1 %v4641_v15  ;;  %v741_v27 = vld [vmem:[%s5247_s9 + $0xf18] sm:$0xff]  ;;  %v4578_v10 = vcombine.high %v613_v6, %v617_v7  ;;  %v4577_v18 = vcombine.low %v613_v6, %v617_v7 }
 0x239   : > { %3981 = vmatprep.subr.bf16.mxu1 %v4634_v21  ;;  %v745_v8 = vld [vmem:[%s5247_s9 + $0xf38] sm:$0xff] }
 0x23a   : > { %3941 = vmatpush1.bf16.msra.mxu0 %v4505_v33  ;;  %v4706_v11 = vcombine.high %v741_v27, %v745_v8  ;;  %v733_v14 = vld [vmem:[%s5247_s9 + $0xed8] sm:$0xff]  ;;  %v4705_v21 = vcombine.low %v741_v27, %v745_v8 }
 0x23b   : > { %3942 = vmatprep.subr.bf16.mxu0 %v4498_v37  ;;  %v737_v15 = vld [vmem:[%s5247_s9 + $0xef8] sm:$0xff]  ;;  %v4569_v37 = vcombine.low %v605_v12, %v609_v13 }
 0x23c   : > { %3982 = vmatpush1.bf16.msra.mxu1 %v4633_v34  ;;  %v4698_v26 = vcombine.high %v733_v14, %v737_v15  ;;  %v725_v33 = vld [vmem:[%s5247_s9 + $0xe98] sm:$0xff] }
 0x23d   : > { %3983 = vmatprep.subr.bf16.mxu1 %v4626_v38  ;;  %v729_v34 = vld [vmem:[%s5247_s9 + $0xeb8] sm:$0xff]  ;;  %v4697_v38 = vcombine.low %v733_v14, %v737_v15 }
 0x23e   : > { %3943 = vmatpush1.bf16.msra.mxu0 %v4497_v44  ;;  %v4690_v41 = vcombine.high %v725_v33, %v729_v34  ;;  %v589_v42 = vld [vmem:[%s5247_s9 + $0xa58] sm:$0xff] }
 0x23f   : > { %3944 = vmatprep.subr.bf16.mxu0 %v4490_v45  ;;  %v593_v43 = vld [vmem:[%s5247_s9 + $0xa78] sm:$0xff]  ;;  %v4561_v45 = vcombine.low %v597_v28, %v601_v31 }
 0x240   : > { %3984 = vmatpush1.bf16.msra.mxu1 %v4625_v19  ;;  %v717_v44 = vld [vmem:[%s5247_s9 + $0xe58] sm:$0xff]  ;;  %v4554_v22 = vcombine.high %v589_v42, %v593_v43 }
 0x241   : > { %3985 = vmatprep.subr.bf16.mxu1 %v4618_v46  ;;  %v721_v19 = vld [vmem:[%s5247_s9 + $0xe78] sm:$0xff]  ;;  %v4689_v46 = vcombine.low %v725_v33, %v729_v34 }
 0x242   : > { %3945 = vmatpush1.bf16.msra.mxu0 %v4489_v49  ;;  %v4682_v47 = vcombine.high %v717_v44, %v721_v19  ;;  %v581_v58 = vld [vmem:[%s5247_s9 + $0xa18] sm:$0xff] }
 0x243   : > { %3946 = vmatprep.subr.bf16.mxu0 %v4482_v51  ;;  %v585_v48 = vld [vmem:[%s5247_s9 + $0xa38] sm:$0xff]  ;;  %v4553_v51 = vcombine.low %v589_v42, %v593_v43 }
 0x244   : > { %3986 = vmatpush1.bf16.msra.mxu1 %v4617_v50  ;;  %v709_v49 = vld [vmem:[%s5247_s9 + $0xe18] sm:$0xff]  ;;  %v4546_v52 = vcombine.high %v581_v58, %v585_v48  ;;  %v4545_v56 = vcombine.low %v581_v58, %v585_v48 }
 0x245   : > { %3987 = vmatprep.subr.bf16.mxu1 %v4610_v59  ;;  %v713_v50 = vld [vmem:[%s5247_s9 + $0xe38] sm:$0xff]  ;;  %v4681_v59 = vcombine.low %v717_v44, %v721_v19 }
 0x246   : > { %3947 = vmatpush1.bf16.msra.mxu0 %v4481_v60  ;;  %v4674_v55 = vcombine.high %v709_v49, %v713_v50  ;;  %v4673_v57 = vcombine.low %v709_v49, %v713_v50 }
 0x247   : > { %3948 = vmatprep.subr.bf16.mxu0 %v4602_v62 }
 0x248   : > { %3988 = vmatpush1.bf16.msra.mxu1 %v4609_v61 }
 0x249   : > { %3989 = vmatprep.subr.bf16.mxu1 %v4730_v17 }
 0x24a   : > { %3949 = vmatpush2.bf16.msra.mxu0 %v4601_v63 }
 0x24b   : > { %3950 = vmatprep.subr.bf16.mxu0 %v4594_v1 }
 0x24c   : > { %3990 = vmatpush2.bf16.msra.mxu1 %v4729_v0 }
 0x24d   : > { %3991 = vmatprep.subr.bf16.mxu1 %v4722_v2 }
 0x24e   : > { %3951 = vmatpush2.bf16.msra.mxu0 %v4593_v54 }
 0x24f   : > { %3952 = vmatprep.subr.bf16.mxu0 %v4586_v4 }
 0x250   : > { %3992 = vmatpush2.bf16.msra.mxu1 %v4721_v3 }
 0x251   : > { %3993 = vmatprep.subr.bf16.mxu1 %v4714_v5 }
 0x252   : > { %3953 = vmatpush2.bf16.msra.mxu0 %v4585_v9 }
 0x253   : > { %3954 = vmatprep.subr.bf16.mxu0 %v4578_v10 }
 0x254   : > { %3994 = vmatpush2.bf16.msra.mxu1 %v4713_v29 }
 0x255   : > { %3995 = vmatprep.subr.bf16.mxu1 %v4706_v11 }
 0x256   : > { %3955 = vmatpush2.bf16.msra.mxu0 %v4577_v18 }
 0x257   : > { %3956 = vmatprep.subr.bf16.mxu0 %v4570_v24 }
 0x258   : > { %3996 = vmatpush2.bf16.msra.mxu1 %v4705_v21 }
 0x259   : > { %3997 = vmatprep.subr.bf16.mxu1 %v4698_v26 }
 0x25a   : > { %3957 = vmatpush2.bf16.msra.mxu0 %v4569_v37 }
 0x25b   : > { %3958 = vmatprep.subr.bf16.mxu0 %v4562_v40 }
 0x25c   : > { %3998 = vmatpush2.bf16.msra.mxu1 %v4697_v38 }
 0x25d   : > { %3999 = vmatprep.subr.bf16.mxu1 %v4690_v41 }
 0x25e   : > { %3959 = vmatpush2.bf16.msra.mxu0 %v4561_v45 }
 0x25f   : > { %3960 = vmatprep.subr.bf16.mxu0 %v4554_v22 }
 0x260   : > { %4000 = vmatpush2.bf16.msra.mxu1 %v4689_v46 }
 0x261   : > { %4001 = vmatprep.subr.bf16.mxu1 %v4682_v47 }
 0x262   : > { %3961 = vmatpush2.bf16.msra.mxu0 %v4553_v51 }
 0x263   : > { %3962 = vmatprep.subr.bf16.mxu0 %v4546_v52 }
 0x264   : > { %4002 = vmatpush2.bf16.msra.mxu1 %v4681_v59 }
 0x265   : > { %4003 = vmatprep.subr.bf16.mxu1 %v4674_v55 }
 0x266   : > { %3963 = vmatpush2.bf16.msra.mxu0 %v4545_v56 }
 0x268   : > { %4004 = vmatpush2.bf16.msra.mxu1 %v4673_v57 }
 0x269   : > { %v3720_v60 = vpop.f32.mrf.mxu0  ;;  %3965 = vmatmul.mubr.bf16.vlgmr.msra.gmra.mxu0 %v5431_v36 }
 0x26b   : > { %v3761_v61 = vpop.f32.mrf.mxu1  ;;  %4006 = vmatmul.mubr.bf16.vlgmr.msra.gmra.mxu1 %v5437_v39  ;;  %v3722_v62 = vpop.f32.mrf.mxu0 }
 0x26c   : > { %v3762_v63 = vadd.f32 %v3761_v61, %v3720_v60 }
 0x26d   : > { %v3763_v17 = vpop.f32.mrf.mxu1  ;;  %v3724_v25 = vpop.f32.mrf.mxu0 }
 0x26e   : > { %v3764_v1 = vadd.f32 %v3763_v17, %v3722_v62 }
 0x26f   : > { %v3765_v30 = vpop.f32.mrf.mxu1  ;;  %v3725_v23 = vpop.f32.mrf.mxu0 }
 0x271   : > { %v3766_v16 = vpop.f32.mrf.mxu1 }
 0x2a9   : > { %v3802_v0 = vpop.f32.mrf.mxu0 }
 0x2aa   : > { %v3803_v2 = vadd.f32 %v3802_v0, %v3762_v63 }
 0x2ab   : > { %v3843_v32 = vpop.f32.mrf.mxu1  ;;  %v3804_v35 = vpop.f32.mrf.mxu0 }
 0x2ac   : > { %v3805_v53 = vadd.f32 %v3804_v35, %v3764_v1  ;;  %v3844_v36 = vadd.f32 %v3843_v32, %v3803_v2 }
 0x2ad   : > { %v3845_v20 = vpop.f32.mrf.mxu1  ;;  %v3806_v54 = vpop.f32.mrf.mxu0 }
 0x2ae   : > { %v3846_v3 = vadd.f32 %v3845_v20, %v3805_v53 }
 0x2af   : > { %v3847_v4 = vpop.f32.mrf.mxu1  ;;  %v3807_v39 = vpop.f32.mrf.mxu0 }
 0x2b0   : > { %v4744_v5 = vpack.c.bf16 %v3846_v3, %v3844_v36 }
 0x2b1   : > { %v3848_v6 = vpop.f32.mrf.mxu1 }
 0x2b2   : > { %4075 = vst [vmem:[%s5672_s8 + $0x10] sm:$0xff] %v4744_v5 }
 0x2e9   : > { %v3884_v7 = vpop.f32.mrf.mxu0 }
 0x2eb   : > { %v3925_v27 = vpop.f32.mrf.mxu1  ;;  %v3886_v8 = vpop.f32.mrf.mxu0 }
 0x2ec   : > { %v3926_v13 = vadd.f32 %v3925_v27, %v3884_v7 }
 0x2ed   : > { %v3927_v9 = vpop.f32.mrf.mxu1  ;;  %v3888_v29 = vpop.f32.mrf.mxu0 }
 0x2ee   : > { %v3928_v15 = vadd.f32 %v3927_v9, %v3886_v8 }
 0x2ef   : > { %v3929_v10 = vpop.f32.mrf.mxu1  ;;  %v3889_v11 = vpop.f32.mrf.mxu0 }
 0x2f1   : > { %v3930_v12 = vpop.f32.mrf.mxu1 }
 0x329   : > { %v3966_v14 = vpop.f32.mrf.mxu0 }
 0x32a   : > { %v3967_v18 = vadd.f32 %v3966_v14, %v3926_v13 }
 0x32b   : > { %v4007_v21 = vpop.f32.mrf.mxu1  ;;  %v3968_v24 = vpop.f32.mrf.mxu0 }
 0x32c   : > { %v3969_v26 = vadd.f32 %v3968_v24, %v3928_v15  ;;  %v4008_v33 = vadd.f32 %v4007_v21, %v3967_v18 }
 0x32d   : > { %v4009_v28 = vpop.f32.mrf.mxu1  ;;  %v3970_v31 = vpop.f32.mrf.mxu0 }
 0x32e   : > { %v4010_v34 = vadd.f32 %v4009_v28, %v3969_v26 }
 0x32f   : > { %v4011_v37 = vpop.f32.mrf.mxu1  ;;  %v3971_v38 = vpop.f32.mrf.mxu0 }
 0x330   : > { %v4745_v40 = vpack.c.bf16 %v4010_v34, %v4008_v33 }
 0x331   : > { %v4012_v41 = vpop.f32.mrf.mxu1 }
 0x332   : > { %4076 = vst [vmem:[%s5672_s8 + $0x18] sm:$0xff] %v4745_v40 }
 0x333   : > { %4931 = shalt.err (!%p4928_p6)
}
 0x334   : > { %s4932_s18 = scalar_lea.hbm %s4090_s4, 512  ;;  %s4936_s27 = scalar_lea.hbm %s5925_s3, 1024 }
 0x335   : > { %p4933_p9 = scmp.ne.s32.totalorder %s4090_s4, %s4932_s18  ;;  %p4937_p8 = scmp.lt.s32.totalorder %s4090_s4, %s5925_s3 }
 0x336   : > { %p4938_p7 = scmp.lt.s32.totalorder %s4936_s27, %s4932_s18 }
 0x337   : > { %p4934_p3 = pnand %p4933_p9, %p5958_p0 }
 0x338   : > { %p4939_p12 = por %p4938_p7, %p4937_p8 }
 0x339   : > { %p4935_p5 = pneg %p4934_p3 }
 0x33b   : > { %p4940_p10 = pnand %p4939_p12, %p4935_p5 }
 0x33d   : > { %4943 = shalt.err (!%p4940_p10)
}
 0x33e   : > { %4753 = dma.vmem_to_hbm [thread:$0]  (%p5958_p0), %s4093_s6, 512, %s4090_s4, %s4078_s24  }
 0x33f PF: > { %s5959_s0 = sld [smem:[#allocation23_spill]]  ;;  %s4104_s11 = sand.u32 1, %s4996_s15  }
 0x340   : > { %s5960_s25 = sld [smem:[#allocation19_spill]]  ;;  %s4105_s30 = scalar_lea.sflag [#allocation7], %s4104_s11 }
 0x345   : > { %p5961_p11 = scmp.ne.s32.totalorder %s5959_s0, 0 }
 0x346   : > { %p5962_p1 = scmp.ge.s32.totalorder %s5960_s25, 2 }
 0x348   : > { %p4765_p2 = pnand %p5962_p1, %p5961_p11 }
 0x34a   : > { %p4766_p4 = pneg %p4765_p2 }
 0x34c   : > { %4991 = dma.done.wait (%p4766_p4), %s4105_s30, 512  }
 0x34d   : > { %4993 = vsyncadd (%p4766_p4), %s4105_s30, 4294966784  ;;  %s26_s22 = sadd.s32 1, %s5960_s25   ;;  %s5963_s9 = sld [smem:[#allocation21_spill]] }
 0x34e   : > { %p23_p13 = scmp.ge.s32.totalorder %s26_s22, 4   ;;  %s5964_s10 = sld [smem:[#allocation17_spill]] }
 0x34f   : > { %s5965_s0 = sld [smem:[#allocation22_spill]]  ;;  %s5968_s15 = smov %s5000_s16 }
 0x350   : > { %s5966_s20 = sld [smem:[#allocation18_spill]]  ;;  %s5969_s16 = smov %s5004_s17 }
 0x351   : > { %s5967_s21 = sld [smem:[#allocation20_spill]]  ;;  %s5971_s18 = smov %s5012_s19 }
 0x352   :  { %25 = sbr.rel (!%p23_p13) target bundleno = 15 (0xf), region = 94 }
 0x353   : > { %s5970_s17 = smov %s5963_s9 }
 0x354   : > { %s5972_s19 = smov %s5964_s10 }
 0x357   :  { %4110 = vsyncpa [#allocation6], 1 }
 0x358   :  { %4112 = vsyncpa [#allocation6 + $0x1], 1 }
 0x359   :  { %4113 = vsyncpa [#allocation9], 1 }
 0x35a   :  { %4115 = vsyncpa [#allocation9 + $0x1], 1 }
 0x35b   :  { %4116 = vsyncpa [#allocation7], 1 }
 0x35c   :  { %4118 = vsyncpa [#allocation7 + $0x1], 1 }

</bundles_post_ra>
